<compile_context>
chip_gen: v5e
topology: v5e:2x2
jax: 0.10.0
libtpu: 0.0.40
codegen_flags: <defaults>
</compile_context>

<pallas_src>
import jax
import jax.numpy as jnp
from jax.experimental import pallas as pl
from jax.experimental.pallas import tpu as pltpu


# ----------------------------- fused Pallas kernel ---------------------------


def _make_fused_gat_kernel(N, H, C1, OUT_PAD, neg_slope=0.2):
    """conv1 (H heads, concat=True) + ELU + conv2 (1 head, concat=False)."""

    bf16 = jnp.bfloat16
    f32 = jnp.float32

    def kernel(x_ref, w1_ref, a1mat_ref, b1_ref, w2_ref, a2mat_ref, b2_ref,
               adj_ref, o_ref):
        # Additive mask bias kept in bf16 (0 on edges, -3e4 on non-edges):
        # no full-size f32 copy of the O(N^2) mask stays live, and the max is
        # taken over MASKED logits (matches the reference semantics).
        mask_bias = (adj_ref[...] - 1.0) * 30000.0            # [N, N] bf16

        x = x_ref[...].astype(bf16)                           # [N, F_in]
        w1 = w1_ref[...].astype(bf16)                         # [F_in, H*C1]
        w2 = w2_ref[...].astype(bf16)                         # [H*C1, OUT_PAD]

        # ---- layer 1: dense projection + all-head logits via MXU -----------
        xw1 = jnp.dot(x, w1, preferred_element_type=f32)      # [N, H*C1]
        # one MXU dot replaces 2H cross-lane reductions:
        #   a1[:, h] = <xw1_h, att_src_h>, a1[:, H+h] = <xw1_h, att_dst_h>
        a1 = jnp.dot(xw1, a1mat_ref[...], preferred_element_type=f32)  # [N, 2H]
        a1_srcT = a1[:, :H].T                                 # [H, N], single transpose

        ys = []
        # H is small & static -> unrolled Python loop.
        # TODO(synk): switch to lax.fori_loop over heads (and a dst-row-tiled
        # grid) if H or N grows, to bound live ranges of the [N, N] temporaries.
        for h in range(H):
            x_h = xw1[:, h * C1:(h + 1) * C1]                 # [N, C1]
            # e[i, j] = a_dst[i] + a_src[j]  (dst rows, src cols)
            e = a1[:, H + h:H + h + 1] + a1_srcT[h:h + 1, :]  # [N, N]
            e = jnp.where(e > 0, e, neg_slope * e)            # LeakyReLU(0.2)
            e = e + mask_bias                                 # mask before max
            m = jnp.max(e, axis=-1, keepdims=True)
            # TODO(synk): cast (e - m) to bf16 before exp on v6e/v7x (bf16 EUP,
            # ~2x exp throughput at large N); keep f32 on v5e (no bf16 EUP).
            p = jnp.exp(e - m)                                # masked -> 0
            denom = jnp.sum(p, axis=-1, keepdims=True)        # >0 (self-loops)
            # un-normalized attention matmul, normalize the [N, C1] result
            out_h = jnp.dot(p.astype(bf16), x_h.astype(bf16),
                            preferred_element_type=f32)       # [N, C1]
            out_h = out_h * pl.reciprocal(denom, approx=True)
            # fused bias + ELU
            y_h = out_h + b1_ref[h:h + 1, :]
            y_h = jnp.where(y_h > 0, y_h, jnp.exp(y_h) - 1.0)  # ELU (alpha=1)
            ys.append(y_h)
            # TODO(synk): attention/feature dropout is train-only; eval => id.

        y = jnp.concatenate(ys, axis=-1)                      # [N, H*C1]
        # ONE K = H*C1 projection instead of H tiny K=C1 dots.
        xw2 = jnp.dot(y.astype(bf16), w2,
                      preferred_element_type=f32)             # [N, OUT_PAD]

        # ---- layer 2: single head, concat=False (mean over 1 head = id) ----
        a2 = jnp.dot(xw2, a2mat_ref[...], preferred_element_type=f32)  # [N, 2]
        e2 = a2[:, 1:2] + a2[:, 0:1].T                        # [N, N]
        e2 = jnp.where(e2 > 0, e2, neg_slope * e2)
        e2 = e2 + mask_bias
        m2 = jnp.max(e2, axis=-1, keepdims=True)
        p2 = jnp.exp(e2 - m2)
        den2 = jnp.sum(p2, axis=-1, keepdims=True)
        out = jnp.dot(p2.astype(bf16), xw2.astype(bf16),
                      preferred_element_type=f32)             # [N, OUT_PAD]
        out = out * pl.reciprocal(den2, approx=True)          # O(N*OUT_PAD)
        o_ref[...] = (out + b2_ref[...]).astype(o_ref.dtype)  # lane-dense store

    return kernel


# ----------------------------- Model wrapper ---------------------------------


def init_params(key, in_ch, hid, out_ch, heads):
    ks = jax.random.split(key, 6)
    s = 0.1
    return {
        "w1": s * jax.random.normal(ks[0], (in_ch, heads * hid), jnp.float32),
        "att_src1": s * jax.random.normal(ks[1], (heads, hid), jnp.float32),
        "att_dst1": s * jax.random.normal(ks[2], (heads, hid), jnp.float32),
        "b1": jnp.zeros((1, heads * hid), jnp.float32),
        "w2": s * jax.random.normal(ks[3], (heads * hid, out_ch), jnp.float32),
        "att_src2": s * jax.random.normal(ks[4], (1, out_ch), jnp.float32),
        "att_dst2": s * jax.random.normal(ks[5], (1, out_ch), jnp.float32),
        "b2": jnp.zeros((1, out_ch), jnp.float32),
    }


def _vmem_limit_bytes():
    # Chip-aware VMEM budget: generous on 128 MiB parts (v5e/v6e), capped so it
    # still leaves headroom on v7x's 64 MiB VMEM.
    cap = 128 * 1024 * 1024
    try:
        cap = int(getattr(pltpu.get_tpu_info(), "vmem_capacity_bytes", cap))
    except Exception:
        pass
    return min(40 * 1024 * 1024, (5 * cap) // 8)


def gat_model_forward(x, adj, params, *, heads, hid, out_ch):
    N, in_ch = x.shape
    H, C1 = heads, hid
    OUT_PAD = ((out_ch + 127) // 128) * 128       # lane-dense output slab

    # Block-structured logit matrices + padded weights/bias (host-side layout
    # plumbing, outside the kernel).
    eye = jnp.eye(H, dtype=jnp.float32)
    a1_src = jnp.einsum("hc,hg->hcg", params["att_src1"], eye).reshape(H * C1, H)
    a1_dst = jnp.einsum("hc,hg->hcg", params["att_dst1"], eye).reshape(H * C1, H)
    a1mat = jnp.concatenate([a1_src, a1_dst], axis=1)          # [H*C1, 2H]

    a2mat = jnp.zeros((OUT_PAD, 2), jnp.float32)
    a2mat = a2mat.at[:out_ch, 0].set(params["att_src2"][0])
    a2mat = a2mat.at[:out_ch, 1].set(params["att_dst2"][0])

    w2_pad = jnp.zeros((H * C1, OUT_PAD), jnp.float32).at[:, :out_ch].set(params["w2"])
    b2_pad = jnp.zeros((1, OUT_PAD), jnp.float32).at[:, :out_ch].set(params["b2"])
    b1_2d = params["b1"].reshape(H, C1)

    adj_bf16 = adj.astype(jnp.bfloat16)                        # compact O(N^2) mask

    flops = int(2 * N * in_ch * H * C1 + 2 * N * H * C1 * 2 * H
                + H * (8 * N * N + 2 * N * N * C1 + 4 * N * C1)
                + 2 * N * H * C1 * OUT_PAD
                + 2 * N * OUT_PAD * 2 + 8 * N * N + 2 * N * N * OUT_PAD
                + 4 * N * OUT_PAD)
    transcendentals = int((H + 1) * (N * N + N) + N * H * C1)
    bytes_accessed = int(sum(int(a.size) * a.dtype.itemsize for a in
                             (x, params["w1"], a1mat, b1_2d, w2_pad, a2mat,
                              b2_pad, adj_bf16)) + N * OUT_PAD * 4)

    kernel = _make_fused_gat_kernel(N, H, C1, OUT_PAD)
    out_pad = pl.pallas_call(
        kernel,
        out_shape=jax.ShapeDtypeStruct((N, OUT_PAD), jnp.float32),
        in_specs=[pl.BlockSpec(memory_space=pltpu.MemorySpace.VMEM)] * 8,
        out_specs=pl.BlockSpec(memory_space=pltpu.MemorySpace.VMEM),
        compiler_params=pltpu.CompilerParams(vmem_limit_bytes=_vmem_limit_bytes()),
        cost_estimate=pl.CostEstimate(flops=flops,
                                      transcendentals=transcendentals,
                                      bytes_accessed=bytes_accessed),
    )(x, params["w1"], a1mat, b1_2d, w2_pad, a2mat, b2_pad, adj_bf16)

    # TODO(synk): for N beyond whole-graph VMEM residency (esp. v7x 64 MiB) and
    # to use the second v7x TensorCore, add a dst-row-tiled grid
    # (dimension_semantics=("parallel",)) so adj/x/xw1 stream as row blocks.
    # TODO(synk): if real workloads are many tiny graphs (N~32), batch them
    # block-diagonally into one call instead of per-graph launches.
    return out_pad[:, :out_ch]


# ----------------------------- Pure-JAX reference ----------------------------


def gat_conv_ref(x, w, att_src, att_dst, adj, bias, concat, apply_elu):
    H, C = att_src.shape
    N = x.shape[0]
    xh = (x @ w).reshape(N, H, C)
    a_src = jnp.einsum("nhc,hc->nh", xh, att_src)
    a_dst = jnp.einsum("nhc,hc->nh", xh, att_dst)
    e = a_dst[:, None, :] + a_src[None, :, :]          # [N_dst, N_src, H]
    e = jnp.where(e > 0, e, 0.2 * e)
    e = jnp.where(adj[:, :, None] > 0, e, -1e30)
    alpha = jax.nn.softmax(e, axis=1)
    out = jnp.einsum("nmh,mhc->nhc", alpha, xh)
    y = out.reshape(N, H * C) if concat else out.mean(axis=1)
    y = y + bias
    if apply_elu:
        y = jnp.where(y > 0, y, jnp.exp(y) - 1.0)
    return y


def gat_model_ref(x, adj, p):
    h = gat_conv_ref(x, p["w1"], p["att_src1"], p["att_dst1"], adj, p["b1"], True, True)
    return gat_conv_ref(h, p["w2"], p["att_src2"], p["att_dst2"], adj, p["b2"], False, False)


# ----------------------------------- Main -------------------------------------

if __name__ == "__main__":
    N = 32          # nodes
    IN_CH = 16      # in_channels
    HID = 8         # hidden_channels
    OUT = 7         # out_channels (num classes)
    HEADS = 4       # attention heads of conv1
    E = 64          # number of random edges

    key = jax.random.PRNGKey(0)
    kx, ke_src, ke_dst, kp = jax.random.split(key, 4)

    x = jax.random.normal(kx, (N, IN_CH), jnp.float32)
    src = jax.random.randint(ke_src, (E,), 0, N)
    dst = jax.random.randint(ke_dst, (E,), 0, N)
    edge_index = jnp.stack([src, dst])              # [2, E], like PyG edge_index

    # Dense adjacency mask adj[dst, src] = 1, plus self-loops (GATConv default).
    adj = jnp.zeros((N, N), jnp.float32)
    adj = adj.at[edge_index[1], edge_index[0]].set(1.0)
    adj = adj.at[jnp.arange(N), jnp.arange(N)].set(1.0)

    params = init_params(kp, IN_CH, HID, OUT, HEADS)

    out = gat_model_forward(x, adj, params, heads=HEADS, hid=HID, out_ch=OUT)
    out = jax.block_until_ready(out)

    ref = gat_model_ref(x, adj, params)
    assert out.shape == (N, OUT)
    # bf16 MXU operands + EUP approximate reciprocal => modest tolerance vs the
    # f32 reference (intentional; documented).
    assert jnp.allclose(out, ref, rtol=5e-2, atol=2e-2), "mismatch vs JAX reference"

    print("KERNEL_OK")
</pallas_src>

<mosaic_0001>
module attributes {stable_mosaic.version = 11 : i64} {
  func.func @kernel(%arg0: memref<32x16xf32, #tpu.memory_space<vmem>>, %arg1: memref<16x32xf32, #tpu.memory_space<vmem>>, %arg2: memref<32x8xf32, #tpu.memory_space<vmem>>, %arg3: memref<4x8xf32, #tpu.memory_space<vmem>>, %arg4: memref<32x128xf32, #tpu.memory_space<vmem>>, %arg5: memref<128x2xf32, #tpu.memory_space<vmem>>, %arg6: memref<1x128xf32, #tpu.memory_space<vmem>>, %arg7: memref<32x32xbf16, #tpu.memory_space<vmem>>, %arg8: memref<32x128xf32, #tpu.memory_space<vmem>>) attributes {dimension_semantics = [], scalar_prefetch = 0 : i64, scratch_operands = 0 : i64, tpu.core_type = #tpu.core_type<tc>} {
    %c0 = arith.constant 0 : index
    %c0_0 = arith.constant 0 : index
    %0 = vector.load %arg7[%c0, %c0_0] : memref<32x32xbf16, #tpu.memory_space<vmem>>, vector<32x32xbf16>
    %cst = arith.constant 1.000000e+00 : bf16
    %1 = vector.broadcast %cst : bf16 to vector<32x32xbf16>
    %2 = arith.subf %0, %1 : vector<32x32xbf16>
    %cst_1 = arith.constant 2.995200e+04 : bf16
    %3 = vector.broadcast %cst_1 : bf16 to vector<32x32xbf16>
    %4 = arith.mulf %2, %3 : vector<32x32xbf16>
    %c0_2 = arith.constant 0 : index
    %c0_3 = arith.constant 0 : index
    %5 = vector.load %arg0[%c0_2, %c0_3] : memref<32x16xf32, #tpu.memory_space<vmem>>, vector<32x16xf32>
    %6 = arith.truncf %5 : vector<32x16xf32> to vector<32x16xbf16>
    %c0_4 = arith.constant 0 : index
    %c0_5 = arith.constant 0 : index
    %7 = vector.load %arg1[%c0_4, %c0_5] : memref<16x32xf32, #tpu.memory_space<vmem>>, vector<16x32xf32>
    %8 = arith.truncf %7 : vector<16x32xf32> to vector<16x32xbf16>
    %c0_6 = arith.constant 0 : index
    %c0_7 = arith.constant 0 : index
    %9 = vector.load %arg4[%c0_6, %c0_7] : memref<32x128xf32, #tpu.memory_space<vmem>>, vector<32x128xf32>
    %10 = arith.truncf %9 : vector<32x128xf32> to vector<32x128xbf16>
    %cst_8 = arith.constant dense<0.000000e+00> : vector<32x32xf32>
    %11 = tpu.matmul %6, %8, %cst_8 {dimension_numbers = #tpu.dot_dimension_numbers<[1], [0], [0], [1], [0, 0, 1, 1], [], []>} : vector<32x16xbf16>, vector<16x32xbf16>, vector<32x32xf32> -> vector<32x32xf32>
    %c0_9 = arith.constant 0 : index
    %c0_10 = arith.constant 0 : index
    %12 = vector.load %arg2[%c0_9, %c0_10] : memref<32x8xf32, #tpu.memory_space<vmem>>, vector<32x8xf32>
    %cst_11 = arith.constant dense<0.000000e+00> : vector<32x8xf32>
    %13 = tpu.matmul %11, %12, %cst_11 {dimension_numbers = #tpu.dot_dimension_numbers<[1], [0], [0], [1], [0, 0, 1, 1], [], []>} : vector<32x32xf32>, vector<32x8xf32>, vector<32x8xf32> -> vector<32x8xf32>
    %14 = vector.extract_strided_slice %13 {offsets = [0, 0], sizes = [32, 4], strides = [1, 1]} : vector<32x8xf32> to vector<32x4xf32>
    %15 = tpu.transpose %14, [1, 0] : vector<32x4xf32> -> vector<4x32xf32>
    %16 = vector.extract_strided_slice %11 {offsets = [0, 0], sizes = [32, 8], strides = [1, 1]} : vector<32x32xf32> to vector<32x8xf32>
    %17 = vector.extract_strided_slice %13 {offsets = [0, 4], sizes = [32, 1], strides = [1, 1]} : vector<32x8xf32> to vector<32x1xf32>
    %18 = vector.extract_strided_slice %15 {offsets = [0, 0], sizes = [1, 32], strides = [1, 1]} : vector<4x32xf32> to vector<1x32xf32>
    %19 = vector.broadcast %17 : vector<32x1xf32> to vector<32x32xf32>
    %20 = vector.broadcast %18 : vector<1x32xf32> to vector<32x32xf32>
    %21 = arith.addf %19, %20 : vector<32x32xf32>
    %cst_12 = arith.constant 0.000000e+00 : f32
    %22 = vector.broadcast %cst_12 : f32 to vector<32x32xf32>
    %23 = arith.cmpf ogt, %21, %22 : vector<32x32xf32>
    %cst_13 = arith.constant 2.000000e-01 : f32
    %24 = vector.broadcast %cst_13 : f32 to vector<32x32xf32>
    %25 = arith.mulf %24, %21 : vector<32x32xf32>
    %26 = arith.select %23, %21, %25 : vector<32x32xi1>, vector<32x32xf32>
    %27 = arith.extf %4 : vector<32x32xbf16> to vector<32x32xf32>
    %28 = arith.addf %26, %27 : vector<32x32xf32>
    %cst_14 = arith.constant dense<0xFF800000> : vector<32xf32>
    %29 = vector.multi_reduction <maximumf>, %28, %cst_14 [1] : vector<32x32xf32> to vector<32xf32>
    %30 = vector.shape_cast %29 : vector<32xf32> to vector<32x1xf32>
    %31 = vector.broadcast %30 : vector<32x1xf32> to vector<32x32xf32>
    %32 = arith.subf %28, %31 : vector<32x32xf32>
    %33 = math.exp %32 : vector<32x32xf32>
    %cst_15 = arith.constant dense<0.000000e+00> : vector<32xf32>
    %34 = vector.multi_reduction <add>, %33, %cst_15 [1] : vector<32x32xf32> to vector<32xf32>
    %35 = vector.shape_cast %34 : vector<32xf32> to vector<32x1xf32>
    %36 = arith.truncf %33 : vector<32x32xf32> to vector<32x32xbf16>
    %37 = arith.truncf %16 : vector<32x8xf32> to vector<32x8xbf16>
    %cst_16 = arith.constant dense<0.000000e+00> : vector<32x8xf32>
    %38 = tpu.matmul %36, %37, %cst_16 {dimension_numbers = #tpu.dot_dimension_numbers<[1], [0], [0], [1], [0, 0, 1, 1], [], []>} : vector<32x32xbf16>, vector<32x8xbf16>, vector<32x8xf32> -> vector<32x8xf32>
    %39 = tpu.reciprocal %35 {approx = true} : vector<32x1xf32> -> vector<32x1xf32>
    %40 = vector.broadcast %39 : vector<32x1xf32> to vector<32x8xf32>
    %41 = arith.mulf %38, %40 : vector<32x8xf32>
    %c0_17 = arith.constant 0 : index
    %c0_18 = arith.constant 0 : index
    %42 = vector.load %arg3[%c0_17, %c0_18] : memref<4x8xf32, #tpu.memory_space<vmem>>, vector<1x8xf32>
    %43 = vector.broadcast %42 : vector<1x8xf32> to vector<32x8xf32>
    %44 = arith.addf %41, %43 : vector<32x8xf32>
    %cst_19 = arith.constant 0.000000e+00 : f32
    %45 = vector.broadcast %cst_19 : f32 to vector<32x8xf32>
    %46 = arith.cmpf ogt, %44, %45 : vector<32x8xf32>
    %47 = math.exp %44 : vector<32x8xf32>
    %cst_20 = arith.constant 1.000000e+00 : f32
    %48 = vector.broadcast %cst_20 : f32 to vector<32x8xf32>
    %49 = arith.subf %47, %48 : vector<32x8xf32>
    %50 = arith.select %46, %44, %49 : vector<32x8xi1>, vector<32x8xf32>
    %51 = vector.extract_strided_slice %11 {offsets = [0, 8], sizes = [32, 8], strides = [1, 1]} : vector<32x32xf32> to vector<32x8xf32>
    %52 = vector.extract_strided_slice %13 {offsets = [0, 5], sizes = [32, 1], strides = [1, 1]} : vector<32x8xf32> to vector<32x1xf32>
    %53 = vector.extract_strided_slice %15 {offsets = [1, 0], sizes = [1, 32], strides = [1, 1]} : vector<4x32xf32> to vector<1x32xf32>
    %54 = vector.broadcast %52 : vector<32x1xf32> to vector<32x32xf32>
    %55 = vector.broadcast %53 : vector<1x32xf32> to vector<32x32xf32>
    %56 = arith.addf %54, %55 : vector<32x32xf32>
    %cst_21 = arith.constant 0.000000e+00 : f32
    %57 = vector.broadcast %cst_21 : f32 to vector<32x32xf32>
    %58 = arith.cmpf ogt, %56, %57 : vector<32x32xf32>
    %cst_22 = arith.constant 2.000000e-01 : f32
    %59 = vector.broadcast %cst_22 : f32 to vector<32x32xf32>
    %60 = arith.mulf %59, %56 : vector<32x32xf32>
    %61 = arith.select %58, %56, %60 : vector<32x32xi1>, vector<32x32xf32>
    %62 = arith.extf %4 : vector<32x32xbf16> to vector<32x32xf32>
    %63 = arith.addf %61, %62 : vector<32x32xf32>
    %cst_23 = arith.constant dense<0xFF800000> : vector<32xf32>
    %64 = vector.multi_reduction <maximumf>, %63, %cst_23 [1] : vector<32x32xf32> to vector<32xf32>
    %65 = vector.shape_cast %64 : vector<32xf32> to vector<32x1xf32>
    %66 = vector.broadcast %65 : vector<32x1xf32> to vector<32x32xf32>
    %67 = arith.subf %63, %66 : vector<32x32xf32>
    %68 = math.exp %67 : vector<32x32xf32>
    %cst_24 = arith.constant dense<0.000000e+00> : vector<32xf32>
    %69 = vector.multi_reduction <add>, %68, %cst_24 [1] : vector<32x32xf32> to vector<32xf32>
    %70 = vector.shape_cast %69 : vector<32xf32> to vector<32x1xf32>
    %71 = arith.truncf %68 : vector<32x32xf32> to vector<32x32xbf16>
    %72 = arith.truncf %51 : vector<32x8xf32> to vector<32x8xbf16>
    %cst_25 = arith.constant dense<0.000000e+00> : vector<32x8xf32>
    %73 = tpu.matmul %71, %72, %cst_25 {dimension_numbers = #tpu.dot_dimension_numbers<[1], [0], [0], [1], [0, 0, 1, 1], [], []>} : vector<32x32xbf16>, vector<32x8xbf16>, vector<32x8xf32> -> vector<32x8xf32>
    %74 = tpu.reciprocal %70 {approx = true} : vector<32x1xf32> -> vector<32x1xf32>
    %75 = vector.broadcast %74 : vector<32x1xf32> to vector<32x8xf32>
    %76 = arith.mulf %73, %75 : vector<32x8xf32>
    %c1 = arith.constant 1 : index
    %c0_26 = arith.constant 0 : index
    %77 = vector.load %arg3[%c1, %c0_26] : memref<4x8xf32, #tpu.memory_space<vmem>>, vector<1x8xf32>
    %78 = vector.broadcast %77 : vector<1x8xf32> to vector<32x8xf32>
    %79 = arith.addf %76, %78 : vector<32x8xf32>
    %cst_27 = arith.constant 0.000000e+00 : f32
    %80 = vector.broadcast %cst_27 : f32 to vector<32x8xf32>
    %81 = arith.cmpf ogt, %79, %80 : vector<32x8xf32>
    %82 = math.exp %79 : vector<32x8xf32>
    %cst_28 = arith.constant 1.000000e+00 : f32
    %83 = vector.broadcast %cst_28 : f32 to vector<32x8xf32>
    %84 = arith.subf %82, %83 : vector<32x8xf32>
    %85 = arith.select %81, %79, %84 : vector<32x8xi1>, vector<32x8xf32>
    %86 = vector.extract_strided_slice %11 {offsets = [0, 16], sizes = [32, 8], strides = [1, 1]} : vector<32x32xf32> to vector<32x8xf32>
    %87 = vector.extract_strided_slice %13 {offsets = [0, 6], sizes = [32, 1], strides = [1, 1]} : vector<32x8xf32> to vector<32x1xf32>
    %88 = vector.extract_strided_slice %15 {offsets = [2, 0], sizes = [1, 32], strides = [1, 1]} : vector<4x32xf32> to vector<1x32xf32>
    %89 = vector.broadcast %87 : vector<32x1xf32> to vector<32x32xf32>
    %90 = vector.broadcast %88 : vector<1x32xf32> to vector<32x32xf32>
    %91 = arith.addf %89, %90 : vector<32x32xf32>
    %cst_29 = arith.constant 0.000000e+00 : f32
    %92 = vector.broadcast %cst_29 : f32 to vector<32x32xf32>
    %93 = arith.cmpf ogt, %91, %92 : vector<32x32xf32>
    %cst_30 = arith.constant 2.000000e-01 : f32
    %94 = vector.broadcast %cst_30 : f32 to vector<32x32xf32>
    %95 = arith.mulf %94, %91 : vector<32x32xf32>
    %96 = arith.select %93, %91, %95 : vector<32x32xi1>, vector<32x32xf32>
    %97 = arith.extf %4 : vector<32x32xbf16> to vector<32x32xf32>
    %98 = arith.addf %96, %97 : vector<32x32xf32>
    %cst_31 = arith.constant dense<0xFF800000> : vector<32xf32>
    %99 = vector.multi_reduction <maximumf>, %98, %cst_31 [1] : vector<32x32xf32> to vector<32xf32>
    %100 = vector.shape_cast %99 : vector<32xf32> to vector<32x1xf32>
    %101 = vector.broadcast %100 : vector<32x1xf32> to vector<32x32xf32>
    %102 = arith.subf %98, %101 : vector<32x32xf32>
    %103 = math.exp %102 : vector<32x32xf32>
    %cst_32 = arith.constant dense<0.000000e+00> : vector<32xf32>
    %104 = vector.multi_reduction <add>, %103, %cst_32 [1] : vector<32x32xf32> to vector<32xf32>
    %105 = vector.shape_cast %104 : vector<32xf32> to vector<32x1xf32>
    %106 = arith.truncf %103 : vector<32x32xf32> to vector<32x32xbf16>
    %107 = arith.truncf %86 : vector<32x8xf32> to vector<32x8xbf16>
    %cst_33 = arith.constant dense<0.000000e+00> : vector<32x8xf32>
    %108 = tpu.matmul %106, %107, %cst_33 {dimension_numbers = #tpu.dot_dimension_numbers<[1], [0], [0], [1], [0, 0, 1, 1], [], []>} : vector<32x32xbf16>, vector<32x8xbf16>, vector<32x8xf32> -> vector<32x8xf32>
    %109 = tpu.reciprocal %105 {approx = true} : vector<32x1xf32> -> vector<32x1xf32>
    %110 = vector.broadcast %109 : vector<32x1xf32> to vector<32x8xf32>
    %111 = arith.mulf %108, %110 : vector<32x8xf32>
    %c2 = arith.constant 2 : index
    %c0_34 = arith.constant 0 : index
    %112 = vector.load %arg3[%c2, %c0_34] : memref<4x8xf32, #tpu.memory_space<vmem>>, vector<1x8xf32>
    %113 = vector.broadcast %112 : vector<1x8xf32> to vector<32x8xf32>
    %114 = arith.addf %111, %113 : vector<32x8xf32>
    %cst_35 = arith.constant 0.000000e+00 : f32
    %115 = vector.broadcast %cst_35 : f32 to vector<32x8xf32>
    %116 = arith.cmpf ogt, %114, %115 : vector<32x8xf32>
    %117 = math.exp %114 : vector<32x8xf32>
    %cst_36 = arith.constant 1.000000e+00 : f32
    %118 = vector.broadcast %cst_36 : f32 to vector<32x8xf32>
    %119 = arith.subf %117, %118 : vector<32x8xf32>
    %120 = arith.select %116, %114, %119 : vector<32x8xi1>, vector<32x8xf32>
    %121 = vector.extract_strided_slice %11 {offsets = [0, 24], sizes = [32, 8], strides = [1, 1]} : vector<32x32xf32> to vector<32x8xf32>
    %122 = vector.extract_strided_slice %13 {offsets = [0, 7], sizes = [32, 1], strides = [1, 1]} : vector<32x8xf32> to vector<32x1xf32>
    %123 = vector.extract_strided_slice %15 {offsets = [3, 0], sizes = [1, 32], strides = [1, 1]} : vector<4x32xf32> to vector<1x32xf32>
    %124 = vector.broadcast %122 : vector<32x1xf32> to vector<32x32xf32>
    %125 = vector.broadcast %123 : vector<1x32xf32> to vector<32x32xf32>
    %126 = arith.addf %124, %125 : vector<32x32xf32>
    %cst_37 = arith.constant 0.000000e+00 : f32
    %127 = vector.broadcast %cst_37 : f32 to vector<32x32xf32>
    %128 = arith.cmpf ogt, %126, %127 : vector<32x32xf32>
    %cst_38 = arith.constant 2.000000e-01 : f32
    %129 = vector.broadcast %cst_38 : f32 to vector<32x32xf32>
    %130 = arith.mulf %129, %126 : vector<32x32xf32>
    %131 = arith.select %128, %126, %130 : vector<32x32xi1>, vector<32x32xf32>
    %132 = arith.extf %4 : vector<32x32xbf16> to vector<32x32xf32>
    %133 = arith.addf %131, %132 : vector<32x32xf32>
    %cst_39 = arith.constant dense<0xFF800000> : vector<32xf32>
    %134 = vector.multi_reduction <maximumf>, %133, %cst_39 [1] : vector<32x32xf32> to vector<32xf32>
    %135 = vector.shape_cast %134 : vector<32xf32> to vector<32x1xf32>
    %136 = vector.broadcast %135 : vector<32x1xf32> to vector<32x32xf32>
    %137 = arith.subf %133, %136 : vector<32x32xf32>
    %138 = math.exp %137 : vector<32x32xf32>
    %cst_40 = arith.constant dense<0.000000e+00> : vector<32xf32>
    %139 = vector.multi_reduction <add>, %138, %cst_40 [1] : vector<32x32xf32> to vector<32xf32>
    %140 = vector.shape_cast %139 : vector<32xf32> to vector<32x1xf32>
    %141 = arith.truncf %138 : vector<32x32xf32> to vector<32x32xbf16>
    %142 = arith.truncf %121 : vector<32x8xf32> to vector<32x8xbf16>
    %cst_41 = arith.constant dense<0.000000e+00> : vector<32x8xf32>
    %143 = tpu.matmul %141, %142, %cst_41 {dimension_numbers = #tpu.dot_dimension_numbers<[1], [0], [0], [1], [0, 0, 1, 1], [], []>} : vector<32x32xbf16>, vector<32x8xbf16>, vector<32x8xf32> -> vector<32x8xf32>
    %144 = tpu.reciprocal %140 {approx = true} : vector<32x1xf32> -> vector<32x1xf32>
    %145 = vector.broadcast %144 : vector<32x1xf32> to vector<32x8xf32>
    %146 = arith.mulf %143, %145 : vector<32x8xf32>
    %c3 = arith.constant 3 : index
    %c0_42 = arith.constant 0 : index
    %147 = vector.load %arg3[%c3, %c0_42] : memref<4x8xf32, #tpu.memory_space<vmem>>, vector<1x8xf32>
    %148 = vector.broadcast %147 : vector<1x8xf32> to vector<32x8xf32>
    %149 = arith.addf %146, %148 : vector<32x8xf32>
    %cst_43 = arith.constant 0.000000e+00 : f32
    %150 = vector.broadcast %cst_43 : f32 to vector<32x8xf32>
    %151 = arith.cmpf ogt, %149, %150 : vector<32x8xf32>
    %152 = math.exp %149 : vector<32x8xf32>
    %cst_44 = arith.constant 1.000000e+00 : f32
    %153 = vector.broadcast %cst_44 : f32 to vector<32x8xf32>
    %154 = arith.subf %152, %153 : vector<32x8xf32>
    %155 = arith.select %151, %149, %154 : vector<32x8xi1>, vector<32x8xf32>
    %156 = tpu.concatenate %50, %85, %120, %155 in 1 : vector<32x8xf32>, vector<32x8xf32>, vector<32x8xf32>, vector<32x8xf32> -> vector<32x32xf32>
    %157 = arith.truncf %156 : vector<32x32xf32> to vector<32x32xbf16>
    %cst_45 = arith.constant dense<0.000000e+00> : vector<32x128xf32>
    %158 = tpu.matmul %157, %10, %cst_45 {dimension_numbers = #tpu.dot_dimension_numbers<[1], [0], [0], [1], [0, 0, 1, 1], [], []>} : vector<32x32xbf16>, vector<32x128xbf16>, vector<32x128xf32> -> vector<32x128xf32>
    %c0_46 = arith.constant 0 : index
    %c0_47 = arith.constant 0 : index
    %159 = vector.load %arg5[%c0_46, %c0_47] : memref<128x2xf32, #tpu.memory_space<vmem>>, vector<128x2xf32>
    %cst_48 = arith.constant dense<0.000000e+00> : vector<32x2xf32>
    %160 = tpu.matmul %158, %159, %cst_48 {dimension_numbers = #tpu.dot_dimension_numbers<[1], [0], [0], [1], [0, 0, 1, 1], [], []>} : vector<32x128xf32>, vector<128x2xf32>, vector<32x2xf32> -> vector<32x2xf32>
    %161 = vector.extract_strided_slice %160 {offsets = [0, 1], sizes = [32, 1], strides = [1, 1]} : vector<32x2xf32> to vector<32x1xf32>
    %162 = vector.extract_strided_slice %160 {offsets = [0, 0], sizes = [32, 1], strides = [1, 1]} : vector<32x2xf32> to vector<32x1xf32>
    %163 = tpu.transpose %162, [1, 0] : vector<32x1xf32> -> vector<1x32xf32>
    %164 = vector.broadcast %161 : vector<32x1xf32> to vector<32x32xf32>
    %165 = vector.broadcast %163 : vector<1x32xf32> to vector<32x32xf32>
    %166 = arith.addf %164, %165 : vector<32x32xf32>
    %cst_49 = arith.constant 0.000000e+00 : f32
    %167 = vector.broadcast %cst_49 : f32 to vector<32x32xf32>
    %168 = arith.cmpf ogt, %166, %167 : vector<32x32xf32>
    %cst_50 = arith.constant 2.000000e-01 : f32
    %169 = vector.broadcast %cst_50 : f32 to vector<32x32xf32>
    %170 = arith.mulf %169, %166 : vector<32x32xf32>
    %171 = arith.select %168, %166, %170 : vector<32x32xi1>, vector<32x32xf32>
    %172 = arith.extf %4 : vector<32x32xbf16> to vector<32x32xf32>
    %173 = arith.addf %171, %172 : vector<32x32xf32>
    %cst_51 = arith.constant dense<0xFF800000> : vector<32xf32>
    %174 = vector.multi_reduction <maximumf>, %173, %cst_51 [1] : vector<32x32xf32> to vector<32xf32>
    %175 = vector.shape_cast %174 : vector<32xf32> to vector<32x1xf32>
    %176 = vector.broadcast %175 : vector<32x1xf32> to vector<32x32xf32>
    %177 = arith.subf %173, %176 : vector<32x32xf32>
    %178 = math.exp %177 : vector<32x32xf32>
    %cst_52 = arith.constant dense<0.000000e+00> : vector<32xf32>
    %179 = vector.multi_reduction <add>, %178, %cst_52 [1] : vector<32x32xf32> to vector<32xf32>
    %180 = vector.shape_cast %179 : vector<32xf32> to vector<32x1xf32>
    %181 = arith.truncf %178 : vector<32x32xf32> to vector<32x32xbf16>
    %182 = arith.truncf %158 : vector<32x128xf32> to vector<32x128xbf16>
    %cst_53 = arith.constant dense<0.000000e+00> : vector<32x128xf32>
    %183 = tpu.matmul %181, %182, %cst_53 {dimension_numbers = #tpu.dot_dimension_numbers<[1], [0], [0], [1], [0, 0, 1, 1], [], []>} : vector<32x32xbf16>, vector<32x128xbf16>, vector<32x128xf32> -> vector<32x128xf32>
    %184 = tpu.reciprocal %180 {approx = true} : vector<32x1xf32> -> vector<32x1xf32>
    %185 = vector.broadcast %184 : vector<32x1xf32> to vector<32x128xf32>
    %186 = arith.mulf %183, %185 : vector<32x128xf32>
    %c0_54 = arith.constant 0 : index
    %c0_55 = arith.constant 0 : index
    %187 = vector.load %arg6[%c0_54, %c0_55] : memref<1x128xf32, #tpu.memory_space<vmem>>, vector<1x128xf32>
    %188 = vector.broadcast %187 : vector<1x128xf32> to vector<32x128xf32>
    %189 = arith.addf %186, %188 : vector<32x128xf32>
    %c0_56 = arith.constant 0 : index
    %c0_57 = arith.constant 0 : index
    %190 = vector.load %arg8[%c0_56, %c0_57] : memref<32x128xf32, #tpu.memory_space<vmem>>, vector<32x128xf32>
    tpu.vector_store %arg8[%c0_56, %c0_57], %189 {strides = array<i32>} : memref<32x128xf32, #tpu.memory_space<vmem>>, vector<32x128xf32>,
    return
  }
}

</mosaic_0001>

<bundles_post_ra>
// kernel: tpu_custom_call.1
= control target key start
LH: loop header
LB: loop body
LE: loop exit
PB: predicated region body
PF: predicated region fallthrough
CT: control target
= control target key end

     0   :  { %vm74_vm0 = vcmask 130048   ;;  %s1720_s0 = inlined_call_operand.vmem [shape: f32[32,16], index: 0, kind: input, shape index: {}]   ;;  %s1721_s1 = inlined_call_operand.vmem [shape: f32[16,32], index: 1, kind: input, shape index: {}]   ;;  %s1722_s2 = inlined_call_operand.vmem [shape: f32[32,8], index: 2, kind: input, shape index: {}]   ;;  %s1723_s3 = inlined_call_operand.vmem [shape: f32[4,8], index: 3, kind: input, shape index: {}]   ;;  %s1724_s4 = inlined_call_operand.vmem [shape: f32[32,128], index: 4, kind: input, shape index: {}]   ;;  %s1725_s5 = inlined_call_operand.vmem [shape: f32[128,2], index: 5, kind: input, shape index: {}]   ;;  %s1726_s6 = inlined_call_operand.vmem [shape: f32[1,128], index: 6, kind: input, shape index: {}]   ;;  %s1727_s7 = inlined_call_operand.vmem [shape: bf16[32,32], index: 7, kind: input, shape index: {}]   ;;  %s1728_s8 = inlined_call_operand.hbm [shape: f32[32,128], index: 8, kind: output, shape index: {}]  }
   0x1   :  { %v65_v0 = vld [vmem:[%s1721_s1] sm:$0xff]  ;;  %v66_v1 = vld [vmem:[%s1721_s1 + $0x8] sm:$0xff]  ;;  %v61_v5 = vld [vmem:[%s1720_s0 + $0x10] sm:$0xff] }
   0x2   :  { %v59_v2 = vld [vmem:[%s1720_s0] sm:$0xff]  ;;  %v67_v3 = vpack.c.bf16 %v66_v1, %v65_v0  ;;  %v60_v4 = vld [vmem:[%s1720_s0 + $0x8] sm:$0xff]  ;;  %v62_v6 = vld [vmem:[%s1720_s0 + $0x18] sm:$0xff] }
   0x3   :  { %v63_v7 = vpack.c.bf16 %v60_v4, %v59_v2  ;;  %v64_v8 = vpack.c.bf16 %v62_v6, %v61_v5  ;;  %v103_v9 = vld [vmem:[%s1722_s2 + $0x18] sm:$0xff]  ;;  %v102_v10 = vld [vmem:[%s1722_s2 + $0x10] sm:$0xff] }
   0x4   :  { %88 = vmatpush.bf16.msra.mxu0 %v67_v3  ;;  %1101 = vmatpush.bf16.msra.mxu1 %v67_v3 }
   0x8   :  { %129 = vmatpush.msrb.mxu1 %v103_v9 }
   0x9   :  { %13 = vsyncpa [#allocation3], 0  ;;  %1058 = vmatmul.msk.bf16.vlgmr.msra.gmra.mxu0 %vm74_vm0, %v63_v7  ;;  %1059 = vmatmul.msk.bf16.vlgmr.msra.gmra.mxu1 %vm74_vm0, %v64_v8  ;;  %v101_v11 = vld [vmem:[%s1722_s2 + $0x8] sm:$0xff]  ;;  %v100_v12 = vld [vmem:[%s1722_s2] sm:$0xff]  ;;  %v1305_v13 = vmov 7   ;;  %v1306_v14 = vmov 6  }
   0xa   :  { %130 = vmatpush.msrb.mxu1 %v102_v10  ;;  %1118 = vset.pattern.permute.xlu2 %v1305_v13  ;;  %v1307_v15 = vmov 5   ;;  %vm104_vm1 = vcmask 261120   ;;  %s1308_s2 = smov 120   ;;  %v1309_v25 = vmov 4   ;;  %s1310_s23 = smov 112   ;;  %v1093_v32 = vld [vmem:[%s1727_s7] sm:$0xff]  }
   0xb   :  { %1117 = vset.pattern.permute.xlu1 %v1306_v14  ;;  %1116 = vset.pattern.permute.xlu0 %v1307_v15  ;;  %v1094_v35 = vunpack.c.l.bf16 %v1093_v32  ;;  %v1100_v36 = vld [vmem:[%s1727_s7 + $0x8] sm:$0xff]   ;;  %v1095_v40 = vunpack.c.h.bf16 %v1093_v32  ;;  %s1311_s7 = smov 104   ;;  %s1312_s30 = smov 8  }
   0xc   :  { %131 = vmatpush.msrb.mxu1 %v101_v11  ;;  %v1098_v39 = vunpack.c.l.bf16 %v1100_v36  ;;  %v1099_v46 = vunpack.c.h.bf16 %v1100_v36  ;;  %s1313_s13 = smov 24   ;;  %s1314_s14 = smov 16  }
   0xd   :  { %v1054_v38 = vadd.f32 -1.0, %v1094_v35  ;;  %v1055_v45 = vadd.f32 -1.0, %v1095_v40  ;;  %s1042_s27 = sshll.u32 %s1728_s8, 4  ;;  %s1317_s29 = smov 128   ;;  %s1043_s27 = int_to_ptr.hbm [resolvable:$true] %s1042_s27 }
   0xe   :  { %132 = vmatpush.msrb.mxu1 %v100_v12  ;;  %v1056_v44 = vadd.f32 -1.0, %v1098_v39  ;;  %v1057_v51 = vadd.f32 -1.0, %v1099_v46 }
   0xf   :  { %v43_v43 = vpack.c.bf16 %v1054_v38, %v1054_v38  ;;  %v44_v50 = vpack.c.bf16 %v1055_v45, %v1055_v45 }
  0x10   :  { %v45_v49 = vpack.c.bf16 %v1056_v44, %v1056_v44  ;;  %v46_v57 = vpack.c.bf16 %v1057_v51, %v1057_v51 }
  0x11   :  { %v47_v48 = vunpack.c.l.bf16 %v43_v43  ;;  %v48_v55 = vunpack.c.l.bf16 %v44_v50 }
  0x12   :  { %v49_v54 = vunpack.c.l.bf16 %v45_v49  ;;  %v50_v1 = vunpack.c.l.bf16 %v46_v57 }
  0x13   :  { %v51_v53 = vmul.f32 29952.0, %v47_v48  ;;  %v52_v61 = vmul.f32 29952.0, %v48_v55 }
  0x14   :  { %v53_v60 = vmul.f32 29952.0, %v49_v54 }
  0x15   :  { %v55_v59 = vpack.c.bf16 %v51_v53, %v51_v53  ;;  %v56_v8 = vpack.c.bf16 %v52_v61, %v52_v61 }
  0x16   :  { %v57_v7 = vpack.c.bf16 %v53_v60, %v53_v60 }
  0x17   :  { %v1427_v6 = vunpack.c.l.bf16 %v55_v59 }
  0x86   :  { %v90_v16 = vpop.f32.mrf.mxu0  ;;  %v95_v17 = vpop.f32.mrf.mxu1 }
  0x87   :  { %1060 = vmatmul.msk.f32.vlgmr.msrb.gmra.mxu1 %vm104_vm1, %v90_v16 }
  0x8e   :  { %v92_v18 = vpop.f32.mrf.mxu0  ;;  %v97_v19 = vpop.f32.mrf.mxu1 }
  0x8f   :  { %v1396_v20 = vpack.c.bf16 %v97_v19, %v95_v17  ;;  %1061 = vmatmul.msk.f32.gmra.mxu1 %vm104_vm1, %v92_v18  ;;  %v1402_v21 = vpack.c.bf16 %v92_v18, %v90_v16 }
  0x91   :  { %275 = vmatpush.bf16.msra.mxu2 %v1396_v20  ;;  %401 = vrot.lane.b32.xlu2 %v1396_v20, %s1308_s2 }
  0x95   :  { %276 = vmatpush.bf16.msra.mxu2 %v1402_v21 }
  0x97   :  { %1062 = vmatmul.msk.f32.gmra.mxu1 %vm104_vm1, %v95_v17 }
  0x9f   :  { %1063 = vmatmul.msk.f32.gmra.mxu1 %vm104_vm1, %v97_v19 }
  0xeb   :  { %v402_v22 = vpop.permute.xlu2 %401 }
  0xec   :  { %417 = vmatpush.bf16.msra.mxu3 %v402_v22 }
 0x104   :  { %v134_v23 = vpop.f32.mrf.mxu1 }
 0x105   :  { %605 = vperm.xlu2 %1118, %v134_v23   ;;  %465 = vperm.xlu1 %1117, %v134_v23  }
 0x106   :  { %323 = vperm.xlu0 %1116, %v134_v23  }
 0x10c   :  { %v137_v24 = vpop.f32.mrf.mxu1 }
 0x10d   :  { %1119 = vset.pattern.permute.xlu1 %v1309_v25  ;;  %609 = vperm.xlu2 %1118, %v137_v24  }
 0x10e   :  { %327 = vperm.xlu0 %1116, %v137_v24   ;;  %180 = vperm.xlu1 %1119, %v134_v23  }
 0x114   :  { %v140_v26 = vpop.f32.mrf.mxu1 }
 0x116   :  { %1120 = vset.pattern.permute.xlu1 %v1306_v14  ;;  %331 = vperm.xlu0 %1116, %v140_v26  }
 0x117   :  { %469 = vperm.xlu1 %1120, %v137_v24  }
 0x11c   :  { %v143_v27 = vpop.f32.mrf.mxu1 }
 0x11e   :  { %1122 = vset.pattern.permute.xlu0 %v1306_v14 }
 0x11f   :  { %1121 = vset.pattern.permute.xlu1 %v1309_v25  ;;  %473 = vperm.xlu0 %1122, %v140_v26  }
 0x120   :  { %185 = vperm.xlu1 %1121, %v137_v24  }
 0x127   :  { %1124 = vset.pattern.permute.xlu0 %v1309_v25 }
 0x128   :  { %1123 = vset.pattern.permute.xlu1 %v1305_v13  ;;  %190 = vperm.xlu0 %1124, %v140_v26  }
 0x129   :  { %613 = vperm.xlu1 %1123, %v140_v26  }
 0x130   :  { %1127 = vset.pattern.permute.xlu0 %v1305_v13 }
 0x131   :  { %1125 = vset.pattern.permute.xlu1 %v1307_v15  ;;  %617 = vperm.xlu0 %1127, %v143_v27   ;;  %v54_v15 = vmul.f32 29952.0, %v50_v1 }
 0x132   :  { %335 = vperm.xlu1 %1125, %v143_v27  }
 0x133   :  { %146 = vxpose.xlu2.b32.start [1/4] (short) (narrow) %v134_v23, 8 }
 0x13a   :  { %1126 = vset.pattern.permute.xlu1 %v1306_v14 }
 0x13b   :  { %147 = vxpose.xlu2.b32.cont [2/4] (short) (narrow) %v137_v24, 8  ;;  %477 = vperm.xlu1 %1126, %v143_v27   ;;  %v1436_v24 = vunpack.c.l.bf16 %v57_v7 }
 0x143   :  { %148 = vxpose.xlu2.b32.cont [3/4] (short) (narrow) %v140_v26, 8  ;;  %1128 = vset.pattern.permute.xlu1 %v1309_v25  ;;  %v1438_v26 = vunpack.c.l.bf16 %v56_v8 }
 0x144   :  { %195 = vperm.xlu1 %1128, %v143_v27  }
 0x14b   :  { %149 = vxpose.xlu2.b32.end [4/4] (short) (narrow) %v143_v27, 8 }
 0x15f   :  { %v606_v37 = vpop.permute.xlu2 %605 }
 0x167   :  { %v610_v47 = vpop.permute.xlu2 %609 }
 0x177   :  { %v466_v28 = vpop.permute.xlu1 %465 }
 0x178   :  { %v324_v30 = vpop.permute.xlu0 %323 }
 0x180   :  { %v1407_v29 = vpop.permute.xlu1 %180  ;;  %v328_v33 = vpop.permute.xlu0 %327 }
 0x188   :  { %v332_v41 = vpop.permute.xlu0 %331 }
 0x189   :  { %v1409_v31 = vpop.permute.xlu1 %469 }
 0x191   :  { %v1423_v52 = vpop.permute.xlu0 %473 }
 0x192   :  { %v1416_v34 = vpop.permute.xlu1 %185 }
 0x19a   :  { %v191_v12 = vpop.permute.xlu0 %190 }
 0x19b   :  { %v1421_v42 = vpop.permute.xlu1 %613 }
 0x1a3   :  { %v618_v45 = vpop.permute.xlu0 %617 }
 0x1a4   :  { %v336_v56 = vpop.permute.xlu1 %335 }
 0x1ad   :  { %v478_v19 = vpop.permute.xlu1 %477 }
 0x1b4   :  { %541 = vrot.lane.b32.xlu2 %v1396_v20, %s1310_s23 }
 0x1b6   :  { %v196_v1 = vpop.permute.xlu1 %195 }
 0x1cc   :  { %v162_v58 = vpop.trf.xlu2 }
 0x1cd   :  { %v338_v62 = vperm.slane %v162_v58, 1  ;;  %v1425_v63 = vperm.slane %v162_v58, 2  ;;  %v620_v0 = vperm.slane %v162_v58, 3  ;;  %v198_v50 = vperm.slane %v162_v58, 0 }
 0x1cf   :  { %v621_v2 = vadd.f32 %v620_v0, %v606_v37  ;;  %v339_v3 = vadd.f32 %v338_v62, %v324_v30  ;;  %v341_v4 = vadd.f32 %v338_v62, %v332_v41  ;;  %v340_v5 = vadd.f32 %v338_v62, %v328_v33 }
 0x1d0   :  { %v481_v9 = vadd.f32 %v1425_v63, %v466_v28  ;;  %v484_v27 = vadd.f32 %v1425_v63, %v478_v19  ;;  %v482_v35 = vadd.f32 %v1425_v63, %v1409_v31  ;;  %v58_v37 = vpack.c.bf16 %v54_v15, %v54_v15 }
 0x1d1   :  { %vm625_vm2 = vcmp.gt.f32.partialorder %v621_v2, 0.0  ;;  %v629_v10 = vmul.f32 0.2, %v621_v2  ;;  %vm343_vm3 = vcmp.gt.f32.partialorder %v339_v3, 0.0  ;;  %v347_v11 = vmul.f32 0.2, %v339_v3 }
 0x1d2   :  { %vm345_vm4 = vcmp.gt.f32.partialorder %v341_v4, 0.0  ;;  %v349_v13 = vmul.f32 0.2, %v341_v4  ;;  %v348_v14 = vmul.f32 0.2, %v340_v5  ;;  %vm344_vm5 = vcmp.gt.f32.partialorder %v340_v5, 0.0 }
 0x1d3   :  { %v633_v16 = vsel %vm625_vm2, %v621_v2, %v629_v10  ;;  %v351_v17 = vsel %vm343_vm3, %v339_v3, %v347_v11  ;;  %v489_v18 = vmul.f32 0.2, %v481_v9  ;;  %vm485_vm6 = vcmp.gt.f32.partialorder %v481_v9, 0.0 }
 0x1d4   :  { %v1431_v22 = vadd.f32 %v633_v16, %v1427_v6  ;;  %v1434_v23 = vadd.f32 %v351_v17, %v1427_v6  ;;  %v353_v25 = vsel %vm345_vm4, %v341_v4, %v349_v13  ;;  %v352_v32 = vsel %vm344_vm5, %v340_v5, %v348_v14 }
 0x1d5   :  { %v493_v33 = vsel %vm485_vm6, %v481_v9, %v489_v18  ;;  %v1448_v36 = vadd.f32 %v353_v25, %v1436_v24  ;;  %v1451_v38 = vadd.f32 %v352_v32, %v1438_v26  ;;  %v492_v39 = vmul.f32 0.2, %v484_v27 }
 0x1d6   :  { %v641_v28 = vsel %vm104_vm1, %v1431_v22, -inf  ;;  %v359_v30 = vsel %vm104_vm1, %v1434_v23, -inf  ;;  %v1454_v40 = vadd.f32 %v493_v33, %v1427_v6  ;;  %vm488_vm7 = vcmp.gt.f32.partialorder %v484_v27, 0.0 }
 0x1d7   :  { %642 = vmax.xlane.f32.xlu1 %v641_v28  ;;  %360 = vmax.xlane.f32.xlu0 %v359_v30  ;;  %v622_v41 = vadd.f32 %v620_v0, %v610_v47  ;;  %v342_v43 = vadd.f32 %v338_v62, %v336_v56  ;;  %v490_v44 = vmul.f32 0.2, %v482_v35  ;;  %v365_v46 = vsel %vm104_vm1, %v1448_v36, -inf }
 0x1d8   :  { %v1458_v31 = vunpack.c.l.bf16 %v58_v37  ;;  %vm486_vm8 = vcmp.gt.f32.partialorder %v482_v35, 0.0  ;;  %v496_v48 = vsel %vm488_vm7, %v484_v27, %v492_v39  ;;  %v624_v49 = vadd.f32 %v620_v0, %v618_v45 }
 0x1d9   :  { %v362_v51 = vsel %vm104_vm1, %v1451_v38, -inf  ;;  %v501_v53 = vsel %vm104_vm1, %v1454_v40, -inf  ;;  %v623_v47 = vadd.f32 %v620_v0, %v1421_v42  ;;  %v494_v54 = vsel %vm486_vm8, %v482_v35, %v490_v44 }
 0x1da   :  { %v1466_v55 = vadd.f32 %v496_v48, %v1458_v31  ;;  %v632_v56 = vmul.f32 0.2, %v624_v49  ;;  %v1469_v57 = vadd.f32 %v494_v54, %v1438_v26  ;;  %vm628_vm9 = vcmp.gt.f32.partialorder %v624_v49, 0.0 }
 0x1db   :  { %v201_v58 = vadd.f32 %v198_v50, %v191_v12  ;;  %v200_v61 = vadd.f32 %v198_v50, %v1416_v34  ;;  %v202_v4 = vadd.f32 %v198_v50, %v196_v1  ;;  %vm626_vm12 = vcmp.gt.f32.partialorder %v622_v41, 0.0 }
 0x1dc   :  { %v510_v59 = vsel %vm104_vm1, %v1466_v55, -inf  ;;  %v636_v60 = vsel %vm628_vm9, %v624_v49, %v632_v56  ;;  %v504_v42 = vsel %vm104_vm1, %v1469_v57, -inf  ;;  %v350_v13 = vmul.f32 0.2, %v342_v43 }
 0x1dd   :  { %366 = vmax.xlane.f32.xlu2 %v365_v46  ;;  %v1477_v62 = vadd.f32 %v636_v60, %v1458_v31  ;;  %v208_v0 = vmul.f32 0.2, %v200_v61  ;;  %vm204_vm10 = vcmp.gt.f32.partialorder %v200_v61, 0.0  ;;  %v210_v34 = vmul.f32 0.2, %v202_v4 }
 0x1de   :  { %vm206_vm11 = vcmp.gt.f32.partialorder %v202_v4, 0.0  ;;  %vm346_vm13 = vcmp.gt.f32.partialorder %v342_v43, 0.0  ;;  %v631_v18 = vmul.f32 0.2, %v623_v47  ;;  %vm627_vm14 = vcmp.gt.f32.partialorder %v623_v47, 0.0 }
 0x1df   :  { %363 = vmax.xlane.f32.xlu1 %v362_v51  ;;  %502 = vmax.xlane.f32.xlu0 %v501_v53  ;;  %v650_v2 = vsel %vm104_vm1, %v1477_v62, -inf  ;;  %v212_v3 = vsel %vm204_vm10, %v200_v61, %v208_v0  ;;  %v214_v8 = vsel %vm206_vm11, %v202_v4, %v210_v34  ;;  %v354_v15 = vsel %vm346_vm13, %v342_v43, %v350_v13 }
 0x1e0   :  { %v1482_v5 = vadd.f32 %v1438_v26, %v212_v3  ;;  %v1489_v9 = vadd.f32 %v1458_v31, %v214_v8  ;;  %v1503_v17 = vadd.f32 %v354_v15, %v1458_v31  ;;  %v635_v25 = vsel %vm627_vm14, %v623_v47, %v631_v18 }
 0x1e1   :  { %v199_v27 = vadd.f32 %v198_v50, %v1407_v29  ;;  %v1509_v28 = vadd.f32 %v635_v25, %v1436_v24  ;;  %v209_v37 = vmul.f32 0.2, %v201_v58  ;;  %vm205_vm2 = vcmp.gt.f32.partialorder %v201_v58, 0.0 }
 0x1e2   :  { %v226_v7 = vsel %vm104_vm1, %v1482_v5, -inf  ;;  %v232_v10 = vsel %vm104_vm1, %v1489_v9, -inf  ;;  %v368_v19 = vsel %vm104_vm1, %v1503_v17, -inf  ;;  %v483_v53 = vadd.f32 %v1425_v63, %v1423_v52 }
 0x1e3   :  { %v207_v30 = vmul.f32 0.2, %v199_v27  ;;  %vm203_vm15 = vcmp.gt.f32.partialorder %v199_v27, 0.0  ;;  %v647_v32 = vsel %vm104_vm1, %v1509_v28, -inf  ;;  %v213_v39 = vsel %vm205_vm2, %v201_v58, %v209_v37 }
 0x1e4   :  { %vm487_vm3 = vcmp.gt.f32.partialorder %v483_v53, 0.0 }
 0x1e5   :  { %511 = vmax.xlane.f32.xlu2 %v510_v59  ;;  %v211_v33 = vsel %vm203_vm15, %v199_v27, %v207_v30  ;;  %v491_v59 = vmul.f32 0.2, %v483_v53 }
 0x1e6   :  { %v1514_v35 = vadd.f32 %v1427_v6, %v211_v33 }
 0x1e7   :  { %505 = vmax.xlane.f32.xlu1 %v504_v42  ;;  %v495_v61 = vsel %vm487_vm3, %v483_v53, %v491_v59  ;;  %vm792_vm3 = vcmask 64512  }
 0x1e8   :  { %v223_v29 = vsel %vm104_vm1, %v1514_v35, -inf  ;;  %v1539_v1 = vadd.f32 %v495_v61, %v1436_v24 }
 0x1ea   :  { %v507_v3 = vsel %vm104_vm1, %v1539_v1, -inf }
 0x1ed   :  { %651 = vmax.xlane.f32.xlu2 %v650_v2 }
 0x1f3   :  { %681 = vrot.lane.b32.xlu0 %v1396_v20, %s1311_s7  ;;  %v630_v20 = vmul.f32 0.2, %v622_v41 }
 0x1f5   :  { %227 = vmax.xlane.f32.xlu2 %v226_v7  ;;  %v634_v12 = vsel %vm626_vm12, %v622_v41, %v630_v20  ;;  %v1521_v41 = vadd.f32 %v1436_v24, %v213_v39 }
 0x1f6   :  { %v1498_v14 = vadd.f32 %v634_v12, %v1438_v26 }
 0x1f7   :  { %v229_v43 = vsel %vm104_vm1, %v1521_v41, -inf }
 0x1f8   :  { %v644_v16 = vsel %vm104_vm1, %v1498_v14, -inf }
 0x1fb   :  { %539 = vrot.lane.b32.xlu0 %v1402_v21, %s1310_s23 }
 0x1fd   :  { %233 = vmax.xlane.f32.xlu2 %v232_v10 }
 0x200   :  { %399 = vrot.lane.b32.xlu1 %v1402_v21, %s1308_s2 }
 0x20e   :  { %v542_v11 = vpop.permute.xlu2 %541 }
 0x20f   :  { %557 = vmatpush.bf16.msrb.mxu0 %v542_v11 }
 0x225   :  { %645 = vmax.xlane.f32.xlu0 %v644_v16 }
 0x22a   :  { %369 = vmax.xlane.f32.xlu1 %v368_v19 }
 0x232   :  { %648 = vmax.xlane.f32.xlu1 %v647_v32 }
 0x239   :  { %679 = vrot.lane.b32.xlu0 %v1402_v21, %s1311_s7  ;;  %s1316_s7 = smov [#allocation2]  }
 0x23a   :  { %224 = vmax.xlane.f32.xlu1 %v223_v29  ;;  %s1040_s28 = sshll.u32 %s1316_s7, 4  ;;  %s1041_s28 = int_to_ptr.vmem [resolvable:$true] %s1040_s28 }
 0x242   :  { %230 = vmax.xlane.f32.xlu1 %v229_v43 }
 0x24a   :  { %v643_v44 = vpop.xlane.xlu1 %642  ;;  %v361_v45 = vpop.xlane.xlu0 %360 }
 0x24b   :  { %v653_v46 = vsub.f32 %v1431_v22, %v643_v44  ;;  %v371_v48 = vsub.f32 %v1434_v23, %v361_v45 }
 0x24d   :  { %v657_v49 = vmul.f32 1.442695, %v653_v46  ;;  %v375_v21 = vmul.f32 1.442695, %v371_v48 }
 0x24f   :  { %1167 = vpow2.f32 %v657_v49 }
 0x250   :  { %1169 = vpow2.f32 %v375_v21  ;;  %v367_v20 = vpop.xlane.xlu2 %366 }
 0x251   :  { %v373_v15 = vsub.f32 %v1448_v36, %v367_v20 }
 0x252   :  { %v364_v50 = vpop.xlane.xlu1 %363  ;;  %v503_v58 = vpop.xlane.xlu0 %502 }
 0x253   :  { %v372_v51 = vsub.f32 %v1451_v38, %v364_v50  ;;  %v513_v38 = vsub.f32 %v1454_v40, %v503_v58  ;;  %v379_v25 = vmul.f32 1.442695, %v373_v15 }
 0x255   :  { %v1530_v47 = vpop.eup %1167  ;;  %v377_v54 = vmul.f32 1.442695, %v372_v51  ;;  %v517_v63 = vmul.f32 1.442695, %v513_v38 }
 0x256   :  { %v1170_v56 = vpop.eup %1169  ;;  %v665_v22 = vsel %vm104_vm1, %v1530_v47, 0.0 }
 0x257   :  { %1171 = vpow2.f32 %v377_v54  ;;  %666 = vadd.xlane.f32.xlu2 %v665_v22  ;;  %v383_v23 = vsel %vm104_vm1, %v1170_v56, 0.0 }
 0x258   :  { %384 = vadd.xlane.f32.xlu1 %v383_v23  ;;  %1173 = vpow2.f32 %v517_v63  ;;  %v1549_v12 = vpop.xlane.xlu2 %511 }
 0x25a   :  { %v506_v60 = vpop.xlane.xlu1 %505 }
 0x25b   :  { %v514_v42 = vsub.f32 %v1469_v57, %v506_v60 }
 0x25d   :  { %v1172_v52 = vpop.eup %1171  ;;  %v519_v2 = vmul.f32 1.442695, %v514_v42 }
 0x25e   :  { %v386_v0 = vsel %vm104_vm1, %v1172_v52, 0.0  ;;  %v1174_v40 = vpop.eup %1173  ;;  %v395_v11 = vpack.c.bf16 %v1172_v52, %v1170_v56 }
 0x25f   :  { %387 = vadd.xlane.f32.xlu2 %v386_v0  ;;  %1175 = vpow2.f32 %v519_v2  ;;  %v525_v34 = vsel %vm104_vm1, %v1174_v40, 0.0 }
 0x260   :  { %v652_v19 = vpop.xlane.xlu2 %651 }
 0x261   :  { %v656_v50 = vsub.f32 %v1477_v62, %v652_v19  ;;  %v1586_v19 = vld [vmem:[%s1723_s3 + $0x1] ss:$0 sm:$0xff] }
 0x263   :  { %508 = vmax.xlane.f32.xlu0 %v507_v3  ;;  %v663_v54 = vmul.f32 1.442695, %v656_v50 }
 0x265   :  { %v682_v4 = vpop.permute.xlu0 %681  ;;  %v1544_v57 = vpop.eup %1175 }
 0x266   :  { %697 = vmatpush.bf16.msra.mxu1 %v682_v4  ;;  %v537_v8 = vpack.c.bf16 %v1544_v57, %v1174_v40  ;;  %v528_v0 = vsel %vm104_vm1, %v1544_v57, 0.0 }
 0x268   :  { %v228_v39 = vpop.xlane.xlu2 %227 }
 0x269   :  { %v236_v45 = vsub.f32 %v1482_v5, %v228_v39 }
 0x26b   :  { %526 = vadd.xlane.f32.xlu0 %v525_v34  ;;  %v241_v48 = vmul.f32 1.442695, %v236_v45 }
 0x26d   :  { %v540_v7 = vpop.permute.xlu0 %539 }
 0x26e   :  { %558 = vmatpush.bf16.msrb.mxu0 %v540_v7 }
 0x270   :  { %v234_v22 = vpop.xlane.xlu2 %233 }
 0x271   :  { %1076 = vmatmul.msk.bf16.vlgmr.msrb.gmra.mxu0 %vm104_vm1, %v537_v8  ;;  %v238_v38 = vsub.f32 %v1489_v9, %v234_v22 }
 0x272   :  { %v400_v10 = vpop.permute.xlu1 %399 }
 0x273   :  { %418 = vmatpush.bf16.msra.mxu3 %v400_v10  ;;  %v245_v63 = vmul.f32 1.442695, %v238_v38 }
 0x276   :  { %1070 = vmatmul.msk.bf16.vlgmr.msra.gmra.mxu3 %vm104_vm1, %v395_v11 }
 0x298   :  { %v646_v13 = vpop.xlane.xlu0 %645 }
 0x299   :  { %v654_v16 = vsub.f32 %v1498_v14, %v646_v13 }
 0x29b   :  { %v659_v18 = vmul.f32 1.442695, %v654_v16 }
 0x29d   :  { %1177 = vpow2.f32 %v659_v18  ;;  %v370_v27 = vpop.xlane.xlu1 %369 }
 0x29e   :  { %v374_v30 = vsub.f32 %v1503_v17, %v370_v27  ;;  %1179 = vpow2.f32 %v379_v25 }
 0x2a0   :  { %v381_v32 = vmul.f32 1.442695, %v374_v30 }
 0x2a2   :  { %1181 = vpow2.f32 %v381_v32 }
 0x2a3   :  { %v1178_v33 = vpop.eup %1177 }
 0x2a4   :  { %v668_v37 = vsel %vm104_vm1, %v1178_v33, 0.0  ;;  %v1180_v43 = vpop.eup %1179  ;;  %v677_v49 = vpack.c.bf16 %v1178_v33, %v1530_v47 }
 0x2a5   :  { %v649_v29 = vpop.xlane.xlu1 %648  ;;  %669 = vadd.xlane.f32.xlu0 %v668_v37  ;;  %v389_v4 = vsel %vm104_vm1, %v1180_v43, 0.0 }
 0x2a6   :  { %v655_v36 = vsub.f32 %v1509_v28, %v649_v29 }
 0x2a8   :  { %v1182_v14 = vpop.eup %1181  ;;  %v661_v44 = vmul.f32 1.442695, %v655_v36 }
 0x2a9   :  { %v396_v46 = vpack.c.bf16 %v1182_v14, %v1180_v43  ;;  %v392_v62 = vsel %vm104_vm1, %v1182_v14, 0.0 }
 0x2aa   :  { %1183 = vpow2.f32 %v661_v44 }
 0x2ab   :  { %1071 = vmatmul.msk.bf16.gmra.mxu3 %vm104_vm1, %v396_v46  ;;  %v680_v17 = vpop.permute.xlu0 %679  ;;  %1185 = vpow2.f32 %v241_v48 }
 0x2ac   :  { %698 = vmatpush.bf16.msra.mxu1 %v680_v17 }
 0x2ad   :  { %v225_v21 = vpop.xlane.xlu1 %224 }
 0x2ae   :  { %v235_v51 = vsub.f32 %v1514_v35, %v225_v21 }
 0x2af   :  { %1082 = vmatmul.msk.bf16.vlgmr.msra.gmra.mxu1 %vm104_vm1, %v677_v49 }
 0x2b0   :  { %v1184_v28 = vpop.eup %1183  ;;  %v239_v53 = vmul.f32 1.442695, %v235_v51 }
 0x2b1   :  { %v671_v5 = vsel %vm104_vm1, %v1184_v28, 0.0  ;;  %v1186_v58 = vpop.eup %1185 }
 0x2b2   :  { %1187 = vpow2.f32 %v239_v53  ;;  %672 = vadd.xlane.f32.xlu2 %v671_v5  ;;  %v250_v42 = vsel %vm104_vm1, %v1186_v58, 0.0 }
 0x2b3   :  { %1189 = vpow2.f32 %v663_v54 }
 0x2b5   :  { %v231_v56 = vpop.xlane.xlu1 %230 }
 0x2b6   :  { %v237_v23 = vsub.f32 %v1521_v41, %v231_v56  ;;  %v516_v41 = vsub.f32 %v1466_v55, %v1549_v12 }
 0x2b8   :  { %v1188_v47 = vpop.eup %1187  ;;  %v243_v61 = vmul.f32 1.442695, %v237_v23  ;;  %v523_v9 = vmul.f32 1.442695, %v516_v41 }
 0x2b9   :  { %v247_v35 = vsel %vm104_vm1, %v1188_v47, 0.0  ;;  %v259_v59 = vpack.c.bf16 %v1186_v58, %v1188_v47  ;;  %v1190_v60 = vpop.eup %1189 }
 0x2ba   :  { %393 = vadd.xlane.f32.xlu2 %v392_v62  ;;  %248 = vadd.xlane.f32.xlu1 %v247_v35  ;;  %v678_v52 = vpack.c.bf16 %v1190_v60, %v1184_v28  ;;  %1191 = vpow2.f32 %v243_v61  ;;  %v674_v13 = vsel %vm104_vm1, %v1190_v60, 0.0  ;;  %v1596_v28 = vld [vmem:[%s1723_s3 + $0x3] ss:$0 sm:$0xff]  ;;  %v1604_v60 = vld [vmem:[%s1723_s3 + $0x2] ss:$0 sm:$0xff] }
 0x2bb   :  { %1064 = vmatmul.msk.bf16.vlgmr.msra.gmra.mxu2 %vm104_vm1, %v259_v59  ;;  %1193 = vpow2.f32 %v245_v63 }
 0x2bc   :  { %1195 = vpow2.f32 %v523_v9 }
 0x2bf   :  { %1083 = vmatmul.msk.bf16.gmra.mxu1 %vm104_vm1, %v678_v52 }
 0x2c0   :  { %v1192_v2 = vpop.eup %1191 }
 0x2c1   :  { %v1194_v3 = vpop.eup %1193  ;;  %v253_v18 = vsel %vm104_vm1, %v1192_v2, 0.0 }
 0x2c2   :  { %251 = vadd.xlane.f32.xlu2 %v250_v42  ;;  %529 = vadd.xlane.f32.xlu1 %v528_v0  ;;  %v260_v40 = vpack.c.bf16 %v1194_v3, %v1192_v2  ;;  %v1196_v55 = vpop.eup %1195  ;;  %v256_v10 = vsel %vm104_vm1, %v1194_v3, 0.0 }
 0x2c3   :  { %v534_v34 = vsel %vm104_vm1, %v1196_v55, 0.0 }
 0x2ca   :  { %390 = vadd.xlane.f32.xlu1 %v389_v4  ;;  %v667_v15 = vpop.xlane.xlu2 %666 }
 0x2cb   :  { %1065 = vmatmul.msk.bf16.gmra.mxu2 %vm104_vm1, %v260_v40  ;;  %v385_v16 = vpop.xlane.xlu1 %384 }
 0x2d2   :  { %535 = vadd.xlane.f32.xlu1 %v534_v34 }
 0x2d6   :  { %v509_v7 = vpop.xlane.xlu0 %508 }
 0x2d7   :  { %v515_v57 = vsub.f32 %v1539_v1, %v509_v7  ;;  %v388_v1 = vpop.xlane.xlu2 %387 }
 0x2d9   :  { %v521_v8 = vmul.f32 1.442695, %v515_v57 }
 0x2da   :  { %257 = vadd.xlane.f32.xlu1 %v256_v10 }
 0x2db   :  { %1197 = vpow2.f32 %v521_v8 }
 0x2dc   :  { %1199 = vrcp.f32 %v385_v16 }
 0x2dd   :  { %1201 = vrcp.f32 %v388_v1 }
 0x2de   :  { %v527_v21 = vpop.xlane.xlu0 %526 }
 0x2e1   :  { %v1198_v11 = vpop.eup %1197 }
 0x2e2   :  { %v531_v20 = vsel %vm104_vm1, %v1198_v11, 0.0  ;;  %v538_v12 = vpack.c.bf16 %v1196_v55, %v1198_v11  ;;  %v1200_v25 = vpop.eup %1199 }
 0x2e3   :  { %532 = vadd.xlane.f32.xlu0 %v531_v20  ;;  %v1202_v37 = vpop.eup %1201 }
 0x2e4   :  { %1077 = vmatmul.msk.bf16.gmra.mxu0 %vm104_vm1, %v538_v12 }
 0x2eb   :  { %675 = vadd.xlane.f32.xlu0 %v674_v13 }
 0x2ee   :  { %v560_v47 = vpop.f32.mrf.mxu0 }
 0x2f3   :  { %254 = vadd.xlane.f32.xlu0 %v253_v18 }
 0x2f6   :  { %v562_v34 = vpop.f32.mrf.mxu0 }
 0x2f9   :  { %v420_v27 = vpop.f32.mrf.mxu3 }
 0x2fa   :  { %v434_v30 = vmul.f32 %v1200_v25, %v420_v27 }
 0x2fc   :  { %v440_v32 = vadd.f32 %v1586_v19, %v434_v30 }
 0x2fe   :  { %v448_v33 = vmul.f32 1.442695, %v440_v32  ;;  %vm444_vm4 = vcmp.gt.f32.partialorder %v440_v32, 0.0 }
 0x300   :  { %1203 = vpow2.f32 %v448_v33 }
 0x301   :  { %v422_v29 = vpop.f32.mrf.mxu3 }
 0x302   :  { %v435_v39 = vmul.f32 %v1202_v37, %v422_v29 }
 0x304   :  { %v441_v36 = vadd.f32 %v1586_v19, %v435_v39 }
 0x306   :  { %v450_v43 = vmul.f32 1.442695, %v441_v36  ;;  %v1204_v14 = vpop.eup %1203  ;;  %vm445_vm5 = vcmp.gt.f32.partialorder %v441_v36, 0.0 }
 0x307   :  { %v1072_v44 = vadd.f32 -1.0, %v1204_v14 }
 0x308   :  { %1205 = vpow2.f32 %v450_v43 }
 0x309   :  { %v460_v17 = vsel %vm444_vm4, %v440_v32, %v1072_v44  ;;  %1207 = vrcp.f32 %v667_v15 }
 0x30a   :  { %1209 = vrcp.f32 %v527_v21 }
 0x30e   :  { %v1206_v45 = vpop.eup %1205 }
 0x30f   :  { %v1073_v46 = vadd.f32 -1.0, %v1206_v45  ;;  %v1208_v53 = vpop.eup %1207 }
 0x310   :  { %v1210_v35 = vpop.eup %1209 }
 0x311   :  { %v461_v48 = vsel %vm445_vm5, %v441_v36, %v1073_v46  ;;  %v574_v38 = vmul.f32 %v1210_v35, %v560_v47  ;;  %vm801_vm5 = vcmask 195584  }
 0x312   :  { %v1129_v49 = vpack.i.bf16 %v461_v48, %v460_v17 }
 0x313   :  { %v580_v42 = vadd.f32 %v1604_v60, %v574_v38 }
 0x314   :  { %1130 = vrot.lane.b32.xlu2 %v1129_v49, %s1312_s30 }
 0x315   :  { %v588_v40 = vmul.f32 1.442695, %v580_v42  ;;  %vm584_vm8 = vcmp.gt.f32.partialorder %v580_v42, 0.0 }
 0x318   :  { %v670_v51 = vpop.xlane.xlu0 %669 }
 0x319   :  { %1211 = vrcp.f32 %v670_v51 }
 0x31f   :  { %v1212_v59 = vpop.eup %1211 }
 0x325   :  { %v1591_v50 = vpop.xlane.xlu2 %672 }
 0x32c   :  { %v700_v5 = vpop.f32.mrf.mxu1 }
 0x32d   :  { %v714_v54 = vmul.f32 %v1208_v53, %v700_v5  ;;  %v1598_v56 = vpop.xlane.xlu1 %248  ;;  %v394_v23 = vpop.xlane.xlu2 %393 }
 0x32e   :  { %v425_v58 = vpop.f32.mrf.mxu3  ;;  %1213 = vrcp.f32 %v394_v23 }
 0x32f   :  { %v720_v22 = vadd.f32 %v1596_v28, %v714_v54  ;;  %v70_v54 = vld [vmem:[%s1724_s4 + $0x10] sm:$0xff] }
 0x331   :  { %v728_v62 = vmul.f32 1.442695, %v720_v22  ;;  %vm724_vm6 = vcmp.gt.f32.partialorder %v720_v22, 0.0 }
 0x333   :  { %1215 = vpow2.f32 %v728_v62 }
 0x334   :  { %v702_v61 = vpop.f32.mrf.mxu1  ;;  %v1214_v2 = vpop.eup %1213 }
 0x335   :  { %v715_v52 = vmul.f32 %v1212_v59, %v702_v61  ;;  %v530_v63 = vpop.xlane.xlu1 %529 }
 0x336   :  { %1217 = vrcp.f32 %v530_v63  ;;  %v427_v0 = vpop.f32.mrf.mxu3 }
 0x337   :  { %v721_v41 = vadd.f32 %v1596_v28, %v715_v52  ;;  %v437_v3 = vmul.f32 %v1214_v2, %v427_v0 }
 0x339   :  { %v730_v9 = vmul.f32 1.442695, %v721_v41  ;;  %v1216_v4 = vpop.eup %1215  ;;  %v443_v8 = vadd.f32 %v1586_v19, %v437_v3  ;;  %vm725_vm7 = vcmp.gt.f32.partialorder %v721_v41, 0.0 }
 0x33a   :  { %v1084_v10 = vadd.f32 -1.0, %v1216_v4 }
 0x33b   :  { %1219 = vpow2.f32 %v730_v9  ;;  %v454_v15 = vmul.f32 1.442695, %v443_v8  ;;  %vm447_vm10 = vcmp.gt.f32.partialorder %v443_v8, 0.0 }
 0x33c   :  { %v1218_v55 = vpop.eup %1217  ;;  %v740_v18 = vsel %vm724_vm6, %v720_v22, %v1084_v10  ;;  %v705_v51 = vpop.f32.mrf.mxu1 }
 0x33d   :  { %v391_v7 = vpop.xlane.xlu1 %390  ;;  %v575_v57 = vmul.f32 %v1218_v55, %v562_v34 }
 0x33e   :  { %1221 = vrcp.f32 %v391_v7 }
 0x33f   :  { %1223 = vpow2.f32 %v588_v40  ;;  %v581_v11 = vadd.f32 %v1604_v60, %v575_v57 }
 0x341   :  { %v1220_v20 = vpop.eup %1219  ;;  %v590_v13 = vmul.f32 1.442695, %v581_v11  ;;  %vm585_vm9 = vcmp.gt.f32.partialorder %v581_v11, 0.0 }
 0x342   :  { %v1085_v12 = vadd.f32 -1.0, %v1220_v20 }
 0x343   :  { %1225 = vpow2.f32 %v590_v13 }
 0x344   :  { %v1222_v16 = vpop.eup %1221  ;;  %v741_v1 = vsel %vm725_vm7, %v721_v41, %v1085_v12  ;;  %1227 = vpow2.f32 %v454_v15  ;;  %v707_v63 = vpop.f32.mrf.mxu1 }
 0x345   :  { %v436_v25 = vmul.f32 %v1222_v16, %v425_v58  ;;  %v1139_v27 = vpack.i.bf16 %v741_v1, %v740_v18  ;;  %v1224_v30 = vpop.eup %1223  ;;  %v71_v58 = vld [vmem:[%s1724_s4 + $0x18] sm:$0xff]  ;;  %v536_v23 = vpop.xlane.xlu1 %535  ;;  %v68_v1 = vld [vmem:[%s1724_s4] sm:$0xff] }
 0x346   :  { %v1078_v33 = vadd.f32 -1.0, %v1224_v30  ;;  %v73_v22 = vpack.c.bf16 %v71_v58, %v70_v54  ;;  %v278_v30 = vpop.f32.mrf.mxu2 }
 0x347   :  { %1140 = vrot.lane.b32.xlu1 %v1139_v27, %s1313_s13  ;;  %v442_v32 = vadd.f32 %v1586_v19, %v436_v25  ;;  %v69_v25 = vld [vmem:[%s1724_s4 + $0x8] sm:$0xff] }
 0x348   :  { %v600_v43 = vsel %vm584_vm8, %v580_v42, %v1078_v33  ;;  %820 = vmatpush.bf16.msrb.mxu2 %v73_v22  ;;  %v72_v27 = vpack.c.bf16 %v69_v25, %v68_v1  ;;  %v838_v25 = vld [vmem:[%s1725_s5 + $0x28] sm:$0xff] }
 0x349   :  { %v452_v37 = vmul.f32 1.442695, %v442_v32  ;;  %v1226_v29 = vpop.eup %1225  ;;  %vm446_vm11 = vcmp.gt.f32.partialorder %v442_v32, 0.0 }
 0x34a   :  { %v1079_v39 = vadd.f32 -1.0, %v1226_v29  ;;  %v1228_v36 = vpop.eup %1227 }
 0x34b   :  { %1229 = vpow2.f32 %v452_v37  ;;  %v1075_v45 = vadd.f32 -1.0, %v1228_v36  ;;  %v1165_v36 = vld [vmem:[%s1723_s3] ss:$0 sm:$0xff] }
 0x34c   :  { %v601_v14 = vsel %vm585_vm9, %v581_v11, %v1079_v39  ;;  %1231 = vrcp.f32 %v1591_v50  ;;  %821 = vmatpush.bf16.msrb.mxu2 %v72_v27 }
 0x34d   :  { %v1134_v44 = vpack.i.bf16 %v601_v14, %v600_v43  ;;  %v463_v48 = vsel %vm447_vm10, %v443_v8, %v1075_v45 }
 0x34e   :  { %v280_v33 = vpop.f32.mrf.mxu2 }
 0x34f   :  { %1135 = vrot.lane.b32.xlu0 %v1134_v44, %s1314_s14 }
 0x351   :  { %v1230_v46 = vpop.eup %1229 }
 0x352   :  { %v1074_v17 = vadd.f32 -1.0, %v1230_v46  ;;  %v1232_v53 = vpop.eup %1231 }
 0x353   :  { %v716_v5 = vmul.f32 %v1232_v53, %v705_v51 }
 0x354   :  { %v462_v19 = vsel %vm446_vm11, %v442_v32, %v1074_v17  ;;  %v252_v32 = vpop.xlane.xlu2 %251  ;;  %v258_v17 = vpop.xlane.xlu1 %257 }
 0x355   :  { %v1149_v49 = vpack.i.bf16 %v463_v48, %v462_v19  ;;  %v722_v50 = vadd.f32 %v1596_v28, %v716_v5 }
 0x356   :  { %v533_v21 = vpop.xlane.xlu0 %532 }
 0x357   :  { %1150 = vrot.lane.b32.xlu0 %v1149_v49, %s1312_s30  ;;  %1233 = vrcp.f32 %v533_v21  ;;  %v732_v38 = vmul.f32 1.442695, %v722_v50  ;;  %vm726_vm12 = vcmp.gt.f32.partialorder %v722_v50, 0.0 }
 0x35d   :  { %v1234_v62 = vpop.eup %1233 }
 0x35e   :  { %v676_v47 = vpop.xlane.xlu0 %675 }
 0x35f   :  { %1235 = vrcp.f32 %v676_v47 }
 0x360   :  { %1237 = vrcp.f32 %v536_v23 }
 0x361   :  { %v565_v35 = vpop.f32.mrf.mxu0  ;;  %1239 = vpow2.f32 %v732_v38 }
 0x362   :  { %v576_v59 = vmul.f32 %v1234_v62, %v565_v35 }
 0x364   :  { %v582_v61 = vadd.f32 %v1604_v60, %v576_v59 }
 0x365   :  { %v1236_v52 = vpop.eup %1235 }
 0x366   :  { %v717_v41 = vmul.f32 %v1236_v52, %v707_v63  ;;  %v592_v42 = vmul.f32 1.442695, %v582_v61  ;;  %v1238_v9 = vpop.eup %1237  ;;  %vm586_vm14 = vcmp.gt.f32.partialorder %v582_v61, 0.0  ;;  %v255_v19 = vpop.xlane.xlu0 %254 }
 0x367   :  { %v1240_v55 = vpop.eup %1239 }
 0x368   :  { %v723_v0 = vadd.f32 %v1596_v28, %v717_v41  ;;  %1241 = vpow2.f32 %v592_v42  ;;  %v1086_v57 = vadd.f32 -1.0, %v1240_v55  ;;  %v847_v55 = vld [vmem:[%s1725_s5 + $0x70] sm:$0xff] }
 0x369   :  { %v567_v2 = vpop.f32.mrf.mxu0 }
 0x36a   :  { %v577_v3 = vmul.f32 %v1238_v9, %v567_v2  ;;  %v734_v4 = vmul.f32 1.442695, %v723_v0  ;;  %vm727_vm13 = vcmp.gt.f32.partialorder %v723_v0, 0.0  ;;  %v742_v20 = vsel %vm726_vm12, %v722_v50, %v1086_v57  ;;  %v283_v50 = vpop.f32.mrf.mxu2 }
 0x36c   :  { %v583_v40 = vadd.f32 %v1604_v60, %v577_v3  ;;  %1243 = vpow2.f32 %v734_v4 }
 0x36e   :  { %v594_v34 = vmul.f32 1.442695, %v583_v40  ;;  %v1242_v7 = vpop.eup %1241  ;;  %vm587_vm15 = vcmp.gt.f32.partialorder %v583_v40, 0.0  ;;  %v1131_v49 = vpop.permute.xlu2 %1130 }
 0x36f   :  { %v1080_v11 = vadd.f32 -1.0, %v1242_v7  ;;  %v1133_v53 = vunpack.i.h.bf16 %v1131_v49  ;;  %v1132_v5 = vunpack.i.l.bf16 %v1131_v49  ;;  %v846_v7 = vld [vmem:[%s1725_s5 + $0x68] sm:$0xff] }
 0x370   :  { %1245 = vpow2.f32 %v594_v34 }
 0x371   :  { %v602_v60 = vsel %vm586_vm14, %v582_v61, %v1080_v11  ;;  %1247 = vrcp.f32 %v1598_v56  ;;  %v844_v11 = vld [vmem:[%s1725_s5 + $0x58] sm:$0xff] }
 0x372   :  { %v1244_v8 = vpop.eup %1243  ;;  %1249 = vrcp.f32 %v252_v32  ;;  %v285_v9 = vpop.f32.mrf.mxu2 }
 0x373   :  { %v1087_v10 = vadd.f32 -1.0, %v1244_v8  ;;  %v845_v8 = vld [vmem:[%s1725_s5 + $0x60] sm:$0xff] }
 0x375   :  { %v743_v28 = vsel %vm727_vm13, %v723_v0, %v1087_v10 }
 0x376   :  { %v1246_v12 = vpop.eup %1245  ;;  %v1154_v13 = vpack.i.bf16 %v743_v28, %v742_v20  ;;  %v843_v28 = vld [vmem:[%s1725_s5 + $0x50] sm:$0xff] }
 0x377   :  { %v1081_v15 = vadd.f32 -1.0, %v1246_v12  ;;  %v1248_v37 = vpop.eup %1247 }
 0x378   :  { %1155 = vrot.lane.b32.xlu0 %v1154_v13, %s1313_s13  ;;  %v1250_v29 = vpop.eup %1249  ;;  %v292_v39 = vmul.f32 %v1248_v37, %v278_v30  ;;  %v842_v13 = vld [vmem:[%s1725_s5 + $0x48] sm:$0xff]  ;;  %v837_v30 = vld [vmem:[%s1725_s5 + $0x20] sm:$0xff] }
 0x379   :  { %v603_v16 = vsel %vm587_vm15, %v583_v40, %v1081_v15  ;;  %v293_v43 = vmul.f32 %v1250_v29, %v280_v33  ;;  %v848_v40 = vld [vmem:[%s1725_s5 + $0x78] sm:$0xff]  ;;  %v841_v15 = vld [vmem:[%s1725_s5 + $0x40] sm:$0xff] }
 0x37a   :  { %v1144_v18 = vpack.i.bf16 %v603_v16, %v602_v60  ;;  %v298_v14 = vadd.f32 %v1165_v36, %v292_v39  ;;  %849 = vmatpush.msrb.mxu3 %v848_v40  ;;  %v840_v60 = vld [vmem:[%s1725_s5 + $0x38] sm:$0xff]  ;;  %v839_v16 = vld [vmem:[%s1725_s5 + $0x30] sm:$0xff] }
 0x37b   :  { %v299_v44 = vadd.f32 %v1165_v36, %v293_v43  ;;  %v836_v29 = vld [vmem:[%s1725_s5 + $0x18] sm:$0xff] }
 0x37c   :  { %1145 = vrot.lane.b32.xlu2 %v1144_v18, %s1314_s14  ;;  %v306_v45 = vmul.f32 1.442695, %v298_v14  ;;  %vm302_vm2 = vcmp.gt.f32.partialorder %v298_v14, 0.0  ;;  %850 = vmatpush.msrb.mxu3 %v847_v55 }
 0x37d   :  { %v308_v46 = vmul.f32 1.442695, %v299_v44  ;;  %vm303_vm4 = vcmp.gt.f32.partialorder %v299_v44, 0.0 }
 0x37e   :  { %1251 = vpow2.f32 %v306_v45  ;;  %851 = vmatpush.msrb.mxu3 %v846_v7 }
 0x37f   :  { %1253 = vpow2.f32 %v308_v46 }
 0x380   :  { %1255 = vrcp.f32 %v255_v19  ;;  %852 = vmatpush.msrb.mxu3 %v845_v8  ;;  %v834_v19 = vld [vmem:[%s1725_s5 + $0x8] sm:$0xff] }
 0x381   :  { %1257 = vrcp.f32 %v258_v17 }
 0x382   :  { %853 = vmatpush.msrb.mxu3 %v844_v11 }
 0x384   :  { %v1252_v48 = vpop.eup %1251  ;;  %854 = vmatpush.msrb.mxu3 %v843_v28 }
 0x385   :  { %v1254_v56 = vpop.eup %1253  ;;  %v1066_v21 = vadd.f32 -1.0, %v1252_v48 }
 0x386   :  { %v1067_v51 = vadd.f32 -1.0, %v1254_v56  ;;  %v1256_v2 = vpop.eup %1255  ;;  %855 = vmatpush.msrb.mxu3 %v842_v13 }
 0x387   :  { %v318_v58 = vsel %vm302_vm2, %v298_v14, %v1066_v21  ;;  %v1258_v3 = vpop.eup %1257  ;;  %v294_v34 = vmul.f32 %v1256_v2, %v283_v50 }
 0x388   :  { %v319_v47 = vsel %vm303_vm4, %v299_v44, %v1067_v51  ;;  %v793_v59 = vsel %vm792_vm3, %v318_v58, %v1132_v5  ;;  %v295_v4 = vmul.f32 %v1258_v3, %v285_v9  ;;  %856 = vmatpush.msrb.mxu3 %v841_v15  ;;  %v835_v44 = vld [vmem:[%s1725_s5 + $0x10] sm:$0xff] }
 0x389   :  { %v794_v35 = vsel %vm792_vm3, %v319_v47, %v1133_v53  ;;  %v300_v10 = vadd.f32 %v1165_v36, %v294_v34 }
 0x38a   :  { %v301_v57 = vadd.f32 %v1165_v36, %v295_v4  ;;  %857 = vmatpush.msrb.mxu3 %v840_v60 }
 0x38b   :  { %v310_v12 = vmul.f32 1.442695, %v300_v10  ;;  %vm304_vm7 = vcmp.gt.f32.partialorder %v300_v10, 0.0 }
 0x38c   :  { %v312_v20 = vmul.f32 1.442695, %v301_v57  ;;  %858 = vmatpush.msrb.mxu3 %v839_v16  ;;  %vm305_vm6 = vcmp.gt.f32.partialorder %v301_v57, 0.0 }
 0x38e   :  { %1259 = vpow2.f32 %v312_v20  ;;  %859 = vmatpush.msrb.mxu3 %v838_v25 }
 0x38f   :  { %1261 = vpow2.f32 %v310_v12 }
 0x390   :  { %860 = vmatpush.msrb.mxu3 %v837_v30 }
 0x392   :  { %861 = vmatpush.msrb.mxu3 %v836_v29 }
 0x394   :  { %v1260_v18 = vpop.eup %1259  ;;  %862 = vmatpush.msrb.mxu3 %v835_v44 }
 0x395   :  { %v1262_v27 = vpop.eup %1261  ;;  %v1069_v33 = vadd.f32 -1.0, %v1260_v18 }
 0x396   :  { %v1068_v37 = vadd.f32 -1.0, %v1262_v27  ;;  %863 = vmatpush.msrb.mxu3 %v834_v19 }
 0x397   :  { %v321_v45 = vsel %vm305_vm6, %v301_v57, %v1069_v33 }
 0x398   :  { %v320_v46 = vsel %vm304_vm7, %v300_v10, %v1068_v37 }
 0x3b9   :  { %v1141_v54 = vpop.permute.xlu1 %1140 }
 0x3ba   :  { %v1143_v38 = vunpack.i.h.bf16 %v1141_v54  ;;  %v1142_v61 = vunpack.i.l.bf16 %v1141_v54 }
 0x3c1   :  { %v1136_v22 = vpop.permute.xlu0 %1135 }
 0x3c2   :  { %v1138_v23 = vunpack.i.h.bf16 %v1136_v22  ;;  %v1137_v62 = vunpack.i.l.bf16 %v1136_v22  ;;  %v833_v22 = vld [vmem:[%s1725_s5] sm:$0xff] }
 0x3c3   :  { %864 = vmatpush.msrb.mxu3 %v833_v22 }
 0x3c4   :  { %v798_v52 = vsel %vm74_vm0, %v794_v35, %v1138_v23  ;;  %v797_v63 = vsel %vm74_vm0, %v793_v59, %v1137_v62  ;;  %v1315_v23 = vmov 1  }
 0x3c5   :  { %v802_v41 = vsel %vm801_vm5, %v797_v63, %v1142_v61  ;;  %v803_v42 = vsel %vm801_vm5, %v798_v52, %v1143_v38  ;;  %1159 = vset.pattern.permute.xlu2 %v1315_v23  ;;  %1160 = vset.pattern.permute.xlu1 %v1315_v23 }
 0x3c6   :  { %v806_v0 = vpack.c.bf16 %v803_v42, %v802_v41  ;;  %1161 = vset.pattern.permute.xlu0 %v1315_v23 }
 0x3c8   :  { %1088 = vmatmul.msk.bf16.vlgmr.msrb.gmra.mxu2 %vm104_vm1, %v806_v0 }
 0x3c9   :  { %v1151_v1 = vpop.permute.xlu0 %1150 }
 0x3ca   :  { %v1153_v39 = vunpack.i.h.bf16 %v1151_v1  ;;  %v1152_v36 = vunpack.i.l.bf16 %v1151_v1 }
 0x3cc   :  { %v795_v48 = vsel %vm792_vm3, %v320_v46, %v1152_v36  ;;  %v796_v56 = vsel %vm792_vm3, %v321_v45, %v1153_v39 }
 0x3d6   :  { %v1146_v32 = vpop.permute.xlu2 %1145 }
 0x3d7   :  { %v1148_v43 = vunpack.i.h.bf16 %v1146_v32  ;;  %v1147_v14 = vunpack.i.l.bf16 %v1146_v32 }
 0x3d9   :  { %v799_v51 = vsel %vm74_vm0, %v795_v48, %v1147_v14  ;;  %v800_v53 = vsel %vm74_vm0, %v796_v56, %v1148_v43 }
 0x3ea   :  { %v1156_v17 = vpop.permute.xlu0 %1155 }
 0x3eb   :  { %v1158_v49 = vunpack.i.h.bf16 %v1156_v17  ;;  %v1157_v21 = vunpack.i.l.bf16 %v1156_v17 }
 0x3ed   :  { %v804_v5 = vsel %vm801_vm5, %v799_v51, %v1157_v21  ;;  %v805_v54 = vsel %vm801_vm5, %v800_v53, %v1158_v49 }
 0x3ee   :  { %v807_v58 = vpack.c.bf16 %v805_v54, %v804_v5  ;;  %v1166_v54 = vld [vmem:[%s1726_s6] ss:$0 sm:$0xff] }
 0x3f0   :  { %1089 = vmatmul.msk.bf16.gmra.mxu2 %vm104_vm1, %v807_v58 }
 0x44b   :  { %v823_v47 = vpop.f32.mrf.mxu2 }
 0x44c   :  { %865 = vmatmul.f32.vlgmr.msrb.gmra.mxu3 %v823_v47 }
 0x453   :  { %v825_v50 = vpop.f32.mrf.mxu2 }
 0x454   :  { %868 = vmatmul.f32.gmra.mxu3 %v825_v50  ;;  %v989_v38 = vpack.c.bf16 %v825_v50, %v823_v47 }
 0x473   :  { %v828_v62 = vpop.f32.mrf.mxu2 }
 0x474   :  { %871 = vmatmul.f32.gmra.mxu3 %v828_v62 }
 0x47b   :  { %v830_v35 = vpop.f32.mrf.mxu2 }
 0x47c   :  { %v990_v59 = vpack.c.bf16 %v830_v35, %v828_v62  ;;  %874 = vmatmul.f32.gmra.mxu3 %v830_v35 }
 0x47e   :  { %1003 = vmatpush.bf16.msra.mxu0 %v990_v59 }
 0x482   :  { %1004 = vmatpush.bf16.msra.mxu0 %v989_v38 }
 0x4cf   :  { %v866_v61 = vpop.f32.mrf.mxu3 }
 0x4d0   :  { %912 = vperm.xlu2 %1159, %v866_v61  }
 0x4d7   :  { %v869_v52 = vpop.f32.mrf.mxu3 }
 0x4d8   :  { %917 = vperm.xlu1 %1160, %v869_v52  }
 0x4f7   :  { %v872_v63 = vpop.f32.mrf.mxu3 }
 0x4f8   :  { %922 = vperm.xlu0 %1161, %v872_v63  }
 0x4ff   :  { %v875_v41 = vpop.f32.mrf.mxu3 }
 0x500   :  { %927 = vperm.xlu2 %1159, %v875_v41  }
 0x50d   :  { %878 = vxpose.xlu1.b32.start [1/4] (short) (narrow) %v866_v61, 8 }
 0x515   :  { %879 = vxpose.xlu1.b32.cont [2/4] (short) (narrow) %v869_v52, 8 }
 0x51d   :  { %880 = vxpose.xlu1.b32.cont [3/4] (short) (narrow) %v872_v63, 8 }
 0x525   :  { %881 = vxpose.xlu1.b32.end [4/4] (short) (narrow) %v875_v41, 8 }
 0x52a   :  { %v913_v0 = vpop.permute.xlu2 %912 }
 0x54a   :  { %v918_v42 = vpop.permute.xlu1 %917 }
 0x55a   :  { %v928_v3 = vpop.permute.xlu2 %927 }
 0x56a   :  { %v923_v4 = vpop.permute.xlu0 %922 }
 0x5b1   :  { %v894_v9 = vpop.trf.xlu1 }
 0x5b2   :  { %v930_v2 = vperm.slane %v894_v9, 0 }
 0x5b4   :  { %v931_v40 = vadd.f32 %v930_v2, %v913_v0  ;;  %v932_v55 = vadd.f32 %v930_v2, %v918_v42  ;;  %v933_v34 = vadd.f32 %v930_v2, %v923_v4  ;;  %v934_v7 = vadd.f32 %v930_v2, %v928_v3 }
 0x5b6   :  { %vm936_vm0 = vcmp.gt.f32.partialorder %v932_v55, 0.0  ;;  %v940_v57 = vmul.f32 0.2, %v932_v55  ;;  %vm935_vm8 = vcmp.gt.f32.partialorder %v931_v40, 0.0  ;;  %v939_v8 = vmul.f32 0.2, %v931_v40 }
 0x5b7   :  { %v941_v20 = vmul.f32 0.2, %v933_v34  ;;  %v942_v28 = vmul.f32 0.2, %v934_v7  ;;  %vm937_vm9 = vcmp.gt.f32.partialorder %v933_v34, 0.0  ;;  %vm938_vm10 = vcmp.gt.f32.partialorder %v934_v7, 0.0 }
 0x5b8   :  { %v944_v10 = vsel %vm936_vm0, %v932_v55, %v940_v57  ;;  %v943_v11 = vsel %vm935_vm8, %v931_v40, %v939_v8 }
 0x5b9   :  { %v948_v12 = vadd.f32 %v944_v10, %v1438_v26  ;;  %v947_v13 = vadd.f32 %v943_v11, %v1427_v6  ;;  %v945_v16 = vsel %vm937_vm9, %v933_v34, %v941_v20  ;;  %v946_v18 = vsel %vm938_vm10, %v934_v7, %v942_v28 }
 0x5ba   :  { %v949_v1 = vadd.f32 %v945_v16, %v1436_v24  ;;  %v950_v25 = vadd.f32 %v946_v18, %v1458_v31 }
 0x5bb   :  { %v954_v15 = vsel %vm104_vm1, %v948_v12, -inf  ;;  %v951_v60 = vsel %vm104_vm1, %v947_v13, -inf }
 0x5bc   :  { %955 = vmax.xlane.f32.xlu0 %v954_v15  ;;  %952 = vmax.xlane.f32.xlu2 %v951_v60  ;;  %v957_v27 = vsel %vm104_vm1, %v949_v1, -inf  ;;  %v960_v26 = vsel %vm104_vm1, %v950_v25, -inf }
 0x5c4   :  { %958 = vmax.xlane.f32.xlu2 %v957_v27  ;;  %961 = vmax.xlane.f32.xlu0 %v960_v26 }
 0x62f   :  { %v956_v6 = vpop.xlane.xlu0 %955  ;;  %v953_v30 = vpop.xlane.xlu2 %952 }
 0x630   :  { %v964_v32 = vsub.f32 %v948_v12, %v956_v6  ;;  %v963_v33 = vsub.f32 %v947_v13, %v953_v30 }
 0x632   :  { %v969_v37 = vmul.f32 1.442695, %v964_v32  ;;  %v967_v29 = vmul.f32 1.442695, %v963_v33 }
 0x634   :  { %1263 = vpow2.f32 %v969_v37 }
 0x635   :  { %1265 = vpow2.f32 %v967_v29 }
 0x637   :  { %v962_v39 = vpop.xlane.xlu0 %961  ;;  %v959_v36 = vpop.xlane.xlu2 %958 }
 0x638   :  { %v966_v43 = vsub.f32 %v950_v25, %v962_v39  ;;  %v965_v24 = vsub.f32 %v949_v1, %v959_v36 }
 0x63a   :  { %v1264_v14 = vpop.eup %1263  ;;  %v973_v31 = vmul.f32 1.442695, %v966_v43  ;;  %v971_v44 = vmul.f32 1.442695, %v965_v24 }
 0x63b   :  { %v1266_v45 = vpop.eup %1265  ;;  %v978_v46 = vsel %vm104_vm1, %v1264_v14, 0.0 }
 0x63c   :  { %v987_v17 = vpack.c.bf16 %v1264_v14, %v1266_v45  ;;  %1267 = vpow2.f32 %v973_v31  ;;  %979 = vadd.xlane.f32.xlu0 %v978_v46  ;;  %v975_v19 = vsel %vm104_vm1, %v1266_v45, 0.0 }
 0x63d   :  { %1269 = vpow2.f32 %v971_v44  ;;  %976 = vadd.xlane.f32.xlu2 %v975_v19 }
 0x63e   :  { %1090 = vmatmul.msk.bf16.vlgmr.msra.gmra.mxu0 %vm104_vm1, %v987_v17 }
 0x642   :  { %v1268_v48 = vpop.eup %1267 }
 0x643   :  { %v1270_v56 = vpop.eup %1269  ;;  %v984_v49 = vsel %vm104_vm1, %v1268_v48, 0.0 }
 0x644   :  { %985 = vadd.xlane.f32.xlu0 %v984_v49  ;;  %v981_v21 = vsel %vm104_vm1, %v1270_v56, 0.0  ;;  %v988_v51 = vpack.c.bf16 %v1268_v48, %v1270_v56 }
 0x645   :  { %982 = vadd.xlane.f32.xlu2 %v981_v21 }
 0x64e   :  { %1091 = vmatmul.msk.bf16.gmra.mxu0 %vm104_vm1, %v988_v51 }
 0x6af   :  { %v980_v5 = vpop.xlane.xlu0 %979 }
 0x6b0   :  { %v977_v53 = vpop.xlane.xlu2 %976 }
 0x6b1   :  { %1271 = vrcp.f32 %v977_v53 }
 0x6b2   :  { %1273 = vrcp.f32 %v980_v5 }
 0x6b7   :  { %v1272_v58 = vpop.eup %1271  ;;  %v986_v61 = vpop.xlane.xlu0 %985 }
 0x6b8   :  { %v983_v23 = vpop.xlane.xlu2 %982  ;;  %v1274_v62 = vpop.eup %1273 }
 0x6b9   :  { %1275 = vrcp.f32 %v983_v23 }
 0x6ba   :  { %1277 = vrcp.f32 %v986_v61 }
 0x6bb   :  { %v1006_v22 = vpop.f32.mrf.mxu0 }
 0x6bc   :  { %v1020_v47 = vmul.f32 %v1272_v58, %v1006_v22 }
 0x6be   :  { %v1028_v50 = vadd.f32 %v1166_v54, %v1020_v47 }
 0x6bf   :  { %v1276_v52 = vpop.eup %1275 }
 0x6c0   :  { %1032 = vst [vmem:[#allocation2] sm:$0xff] %v1028_v50  ;;  %v1278_v0 = vpop.eup %1277 }
 0x6c3   :  { %v1008_v35 = vpop.f32.mrf.mxu0 }
 0x6c4   :  { %v1021_v59 = vmul.f32 %v1274_v62, %v1008_v35 }
 0x6c6   :  { %v1029_v38 = vadd.f32 %v1166_v54, %v1021_v59 }
 0x6c8   :  { %1033 = vst [vmem:[#allocation2 + $0x8] sm:$0xff] %v1029_v38 }
 0x6cb   :  { %v1011_v63 = vpop.f32.mrf.mxu0 }
 0x6cc   :  { %v1022_v41 = vmul.f32 %v1276_v52, %v1011_v63 }
 0x6ce   :  { %v1030_v42 = vadd.f32 %v1166_v54, %v1022_v41 }
 0x6d0   :  { %1034 = vst [vmem:[#allocation2 + $0x10] sm:$0xff] %v1030_v42 }
 0x6d3   :  { %v1013_v9 = vpop.f32.mrf.mxu0 }
 0x6d4   :  { %v1023_v2 = vmul.f32 %v1278_v0, %v1013_v9 }
 0x6d6   :  { %v1031_v3 = vadd.f32 %v1166_v54, %v1023_v2 }
 0x6d8   :  { %1035 = vst [vmem:[#allocation2 + $0x18] sm:$0xff] %v1031_v3 }
 0x6d9   :  { %1048 = dma.vmem_to_hbm [thread:$0]  %s1041_s28, 512, %s1043_s27, [#allocation3], %s1317_s29, %s1317_s29, %s1312_s30  }
 0x6da   :  { %1303 = dma.done.wait [#allocation3], 512  }
 0x6db   :  { %1304 = vsyncadd [#allocation3], 4294966784 }
 0x6dc   :  { %1053 = vsyncpa [#allocation3], 1 }

</bundles_post_ra>
